<compile_context>
chip_gen: v7x
topology: tpu7x:2x2x1
jax: 0.10.0
libtpu: 0.0.40
codegen_flags: <defaults>
</compile_context>

<pallas_src>
import jax
import jax.numpy as jnp
import numpy as np
from jax.experimental import pallas as pl


# ----------------------------------------------------------------------------
# Fused kernel.
#   x_ref    : (2C, B*P)  f32   search features, rows 0:C conv4 / C:2C conv3,
#                               lanes = [batch0 pixels | batch1 pixels | ...]
#   z_ref    : (B, 2C, Pz) f32  template features (both levels, channel-stacked)
#   mask_ref : (B, 1, Pz)  f32  template mask
#   grid_ref : (16, B*P)   f32  rows 0:8 = decode offsets, rows 8:16 = decode
#                               multipliers (precomputed constants)
#   w_ref    : (7, Co, Cw) bf16 packed tower weights
#   b_ref    : (7, Co, 1)  f32  packed tower biases
#   out_ref  : (Co+16, B*P) f32 rows 0:Co reg_feature | Co:Co+4 reg_score |
#                               Co+4:Co+8 pred_box | Co+8 cls_score | rest pad
# ----------------------------------------------------------------------------
def l2m_fused_kernel(x_ref, z_ref, mask_ref, grid_ref, w_ref, b_ref, out_ref):
    B = z_ref.shape[0]
    C2 = x_ref.shape[0]
    C = C2 // 2
    BP = x_ref.shape[1]
    P = BP // B
    Co = out_ref.shape[0] - 16
    Cw = w_ref.shape[2]

    # ---- mask-weighted pooling of both template pyramid levels (one pass) ----
    x = x_ref[...]                                        # (2C, B*P)
    z_parts = []
    for b in range(B):                                    # B is tiny & static
        m = mask_ref[b]                                   # (1, Pz)
        den = jnp.sum(m, axis=1, keepdims=True)           # (1, 1)
        # guard all-zero mask; divide on the EUP slot
        inv = jnp.where(den > 0.0,
                        pl.reciprocal(jnp.maximum(den, 1e-6), approx=True),
                        0.0)
        zp = jnp.sum(z_ref[b] * m, axis=1, keepdims=True) * inv   # (2C, 1)
        z_parts.append(jnp.broadcast_to(zp, (C2, P)))
    z_big = jnp.concatenate(z_parts, axis=1) if B > 1 else z_parts[0]  # (2C, B*P)

    # pointwise correlation (search x pooled-template), both levels at once
    x_corr = jnp.maximum(x * z_big, 0.0)                  # (2C, B*P)
    x4c = x_corr[0:C, :]                                  # conv4 level
    x3c = x_corr[C:, :]                                   # conv3 level

    def wmat(i, k_in):
        w = w_ref[i]                                      # (Co, Cw) bf16
        return w if k_in == Cw else w[:, 0:k_in]

    def bias(i):
        return b_ref[i]                                   # (Co, 1) f32

    def mm(w, v):
        # bf16 MXU matmul, f32 accumulate; spatial*batch axis stays on lanes.
        return jnp.dot(w, v.astype(w.dtype), preferred_element_type=jnp.float32)

    # --- regression tower (conv4 features, towernum=3), whole batch at once ---
    h = jnp.maximum(mm(wmat(0, C), x4c) + bias(0), 0.0)   # (Co, B*P)
    h = jnp.maximum(mm(wmat(1, Co), h) + bias(1), 0.0)
    h = jnp.maximum(mm(wmat(2, Co), h) + bias(2), 0.0)
    out_ref[0:Co, :] = h                                  # reg_feature

    # --- prediction head + pred_to_image fused (8-row unmasked store) ---
    # weight index 3 holds [wp; wp] (rows 0:8), so s8 rows 0:4 == rows 4:8.
    raw = mm(wmat(3, Co), h) + bias(3)                    # (Co, B*P)
    s8 = jnp.exp(raw[0:8, :])                             # (8, B*P)
    # rows 0:4: 0 + 1*score  = reg_score
    # rows 4:8: gxy + sign*score = [x1, y1, x2, y2] on the image grid
    out_ref[Co:Co + 8, :] = grid_ref[0:8, :] + grid_ref[8:16, :] * s8

    # --- classification tower (conv3 features + fused reg feature) ---
    g = jnp.maximum(mm(wmat(4, C), x3c) + bias(4), 0.0)   # (Co, B*P)
    g = g + h
    g = jnp.maximum(mm(wmat(5, Co), g) + bias(5), 0.0)
    craw = mm(wmat(6, Co), g) + bias(6)                   # row 0 = cls score
    out_ref[Co + 8:Co + 16, :] = craw[0:8, :]             # rows 1:8 = zero pad


def learn2match_fused(x_all, z_all, mask, grid, w_packed, b_packed):
    C2, BP = x_all.shape
    C = C2 // 2
    Co = w_packed.shape[1]
    out_rows = Co + 16

    in_bytes = sum(int(a.size) * a.dtype.itemsize
                   for a in (x_all, z_all, mask, grid, w_packed, b_packed))
    out_bytes = out_rows * BP * 4
    cost = pl.CostEstimate(
        flops=int(2 * BP * (2 * Co * C + 5 * Co * Co)),
        transcendentals=int(8 * BP),
        bytes_accessed=int(in_bytes + out_bytes),
    )

    # No grid: every operand is a single full-array VMEM block (working set
    # < 1 MiB, far under the scoped VMEM limit on v5e/v6e/v7x).
    return pl.pallas_call(
        l2m_fused_kernel,
        out_shape=jax.ShapeDtypeStruct((out_rows, BP), jnp.float32),
        cost_estimate=cost,
    )(x_all, z_all, mask, grid, w_packed, b_packed)


# ----------------------------------------------------------------------------
# Module wrapper
# ----------------------------------------------------------------------------
class Learn2MatchPallas:
    def __init__(self, in_channels=32, out_channels=32, roi_size=3,
                 key=jax.random.PRNGKey(42)):
        self.search_size = 255
        self.stride = 8
        self.roi_size = roi_size  # TODO(synk): only used by RoIAlign/PrRoIPool (not implemented)

        C, Co = in_channels, out_channels
        assert C % 8 == 0 and Co % 16 == 0 and Co >= 16, "channel alignment"
        self.in_channels, self.out_channels = C, Co

        ks = jax.random.split(key, 7)

        def rnd(k, shape):
            return np.asarray(jax.random.normal(k, shape, jnp.float32)) * 0.05

        rw1 = rnd(ks[0], (Co, C))
        rw2 = rnd(ks[1], (Co, Co))
        rw3 = rnd(ks[2], (Co, Co))
        wp = rnd(ks[3], (4, Co))
        cw1 = rnd(ks[4], (Co, C))
        cw2 = rnd(ks[5], (Co, Co))
        wc = rnd(ks[6], (1, Co))

        # Pack all 7 weight matrices into ONE bf16 operand (7, Co, Cw).
        # Index 3 stores [wp; wp] so the kernel decodes score+box in one go;
        # index 6 stores wc in row 0 (rows 1: padded with zeros).
        Cw = max(C, Co)
        mats = [rw1, rw2, rw3, np.concatenate([wp, wp], axis=0), cw1, cw2, wc]
        w_packed = np.zeros((7, Co, Cw), np.float32)
        for i, m in enumerate(mats):
            r, c = m.shape
            w_packed[i, :r, :c] = m
        self.w_packed = jnp.asarray(w_packed, dtype=jnp.bfloat16)
        # Biases (all zero-initialized, kept f32) packed the same way.
        self.b_packed = jnp.zeros((7, Co, 1), jnp.float32)

    # Precompute decode grid (matches reference grids()/pred_to_image exactly):
    # gx[j] = (j - W//2)*stride + search_size//2, analogous gy.
    def _make_grid(self, B, H, W):
        P = H * W
        stride = float(self.stride)
        off = float(self.search_size // 2)
        jx = (np.arange(W, dtype=np.float32) - float(W // 2)) * stride + off
        iy = (np.arange(H, dtype=np.float32) - float(H // 2)) * stride + off
        gx = np.tile(jx[None, :], (H, 1)).reshape(-1)          # (P,)
        gy = np.tile(iy[:, None], (1, W)).reshape(-1)          # (P,)
        offset = np.concatenate(
            [np.zeros((4, P), np.float32),
             np.stack([gx, gy, gx, gy], axis=0)], axis=0)       # (8, P)
        sign = np.array([-1.0, -1.0, 1.0, 1.0], np.float32)[:, None]
        mult = np.concatenate(
            [np.ones((4, P), np.float32),
             (sign * np.ones((1, P), np.float32))], axis=0)     # (8, P)
        grid = np.concatenate([offset, mult], axis=0)           # (16, P)
        return jnp.asarray(np.tile(grid, (1, B)))               # (16, B*P)

    def forward(self, inputs):
        xfs4 = inputs["xf_conv4"]          # (B, C, H, W)
        xfs3 = inputs["xf_conv3"]          # (B, C, H, W)
        zfs4 = inputs["zf_conv4"]          # (B, C, Hz, Wz)
        zfs3 = inputs["zf_conv3"]          # (B, C, Hz, Wz)
        mask = inputs["template_mask"]     # (B, Hz, Wz)
        _target_box = inputs["target_box"]  # (B, 4)
        # TODO(synk): PrRoIPool(target_box) has no clean Pallas equivalent; template
        # aggregation uses the mask-weighted pool instead.

        B, C, H, W = xfs4.shape
        Hz, Wz = zfs4.shape[2], zfs4.shape[3]
        P, Pz = H * W, Hz * Wz
        Co = self.out_channels

        # Lane-stack the batch (one cheap <64 KiB transpose) and channel-stack
        # the two pyramid levels -> single search-feature operand (2C, B*P).
        x_all = (jnp.concatenate([xfs4, xfs3], axis=1)
                 .reshape(B, 2 * C, P).transpose(1, 0, 2).reshape(2 * C, B * P))
        z_all = jnp.concatenate([zfs4, zfs3], axis=1).reshape(B, 2 * C, Pz)
        m = mask.reshape(B, 1, Pz).astype(jnp.float32)
        grid = self._make_grid(B, H, W)

        out = learn2match_fused(x_all, z_all, m, grid,
                                self.w_packed, self.b_packed)   # (Co+16, B*P)

        def unstack(rows):   # (R, B*P) -> (B, R, H, W)
            R = rows.shape[0]
            return rows.reshape(R, B, P).transpose(1, 0, 2).reshape(B, R, H, W)

        reg_feature = unstack(out[0:Co])
        reg_score = unstack(out[Co:Co + 4])
        pred_box = unstack(out[Co + 4:Co + 8])
        cls_score = unstack(out[Co + 8:Co + 9])

        reg_outputs = {"reg_score": reg_score, "reg_feature": reg_feature,
                       "zf_conv4": zfs4, "zf_conv3": zfs3}
        cls_outputs = {"cls_score": cls_score, "pred_box": pred_box}
        return cls_outputs, reg_outputs


if __name__ == "__main__":
    B, C, H, W = 2, 32, 16, 16
    Hz = Wz = 8

    key = jax.random.PRNGKey(0)
    k = jax.random.split(key, 6)
    inputs = {
        "xf_conv4": jax.random.normal(k[0], (B, C, H, W), jnp.float32),
        "xf_conv3": jax.random.normal(k[1], (B, C, H, W), jnp.float32),
        "zf_conv4": jax.random.normal(k[2], (B, C, Hz, Wz), jnp.float32),
        "zf_conv3": jax.random.normal(k[3], (B, C, Hz, Wz), jnp.float32),
        "template_mask": (jax.random.uniform(k[4], (B, Hz, Wz)) > 0.3
                          ).astype(jnp.float32),
        "target_box": jax.random.uniform(k[5], (B, 4), jnp.float32,
                                         minval=32.0, maxval=200.0),
    }

    model = Learn2MatchPallas(in_channels=C, out_channels=C, roi_size=3)
    cls_outputs, reg_outputs = model.forward(inputs)
    jax.block_until_ready((cls_outputs, reg_outputs))

    assert cls_outputs["cls_score"].shape == (B, 1, H, W)
    assert cls_outputs["pred_box"].shape == (B, 4, H, W)
    assert reg_outputs["reg_score"].shape == (B, 4, H, W)
    assert reg_outputs["reg_feature"].shape == (B, C, H, W)
    assert bool(jnp.all(jnp.isfinite(cls_outputs["pred_box"])))
    assert bool(jnp.all(reg_outputs["reg_score"] > 0.0))
    print("KERNEL_OK")
</pallas_src>

<mosaic_0001>
module attributes {stable_mosaic.version = 11 : i64} {
  func.func @l2m_fused_kernel(%arg0: memref<64x512xf32, #tpu.memory_space<vmem>>, %arg1: memref<2x64x64xf32, #tpu.memory_space<vmem>>, %arg2: memref<2x1x64xf32, #tpu.memory_space<vmem>>, %arg3: memref<16x512xf32, #tpu.memory_space<vmem>>, %arg4: memref<7x32x32xbf16, #tpu.memory_space<vmem>>, %arg5: memref<7x32x1xf32, #tpu.memory_space<vmem>>, %arg6: memref<48x512xf32, #tpu.memory_space<vmem>>) attributes {dimension_semantics = [], scalar_prefetch = 0 : i64, scratch_operands = 0 : i64, tpu.core_type = #tpu.core_type<tc>} {
    %c0 = arith.constant 0 : index
    %c0_0 = arith.constant 0 : index
    %0 = vector.load %arg0[%c0, %c0_0] : memref<64x512xf32, #tpu.memory_space<vmem>>, vector<64x512xf32>
    %c0_1 = arith.constant 0 : index
    %c0_2 = arith.constant 0 : index
    %c0_3 = arith.constant 0 : index
    %1 = vector.load %arg2[%c0_1, %c0_2, %c0_3] : memref<2x1x64xf32, #tpu.memory_space<vmem>>, vector<1x1x64xf32>
    %2 = vector.shape_cast %1 : vector<1x1x64xf32> to vector<1x64xf32>
    %cst = arith.constant dense<0.000000e+00> : vector<1xf32>
    %3 = vector.multi_reduction <add>, %2, %cst [1] : vector<1x64xf32> to vector<1xf32>
    %4 = vector.shape_cast %3 : vector<1xf32> to vector<1x1xf32>
    %cst_4 = arith.constant 0.000000e+00 : f32
    %5 = vector.broadcast %cst_4 : f32 to vector<1x1xf32>
    %6 = arith.cmpf ogt, %4, %5 : vector<1x1xf32>
    %cst_5 = arith.constant 9.99999997E-7 : f32
    %7 = vector.broadcast %cst_5 : f32 to vector<1x1xf32>
    %8 = arith.maximumf %4, %7 : vector<1x1xf32>
    %9 = tpu.reciprocal %8 {approx = true} : vector<1x1xf32> -> vector<1x1xf32>
    %cst_6 = arith.constant 0.000000e+00 : f32
    %10 = vector.broadcast %cst_6 : f32 to vector<1x1xf32>
    %11 = arith.select %6, %9, %10 : vector<1x1xi1>, vector<1x1xf32>
    %c0_7 = arith.constant 0 : index
    %c0_8 = arith.constant 0 : index
    %c0_9 = arith.constant 0 : index
    %12 = vector.load %arg1[%c0_7, %c0_8, %c0_9] : memref<2x64x64xf32, #tpu.memory_space<vmem>>, vector<1x64x64xf32>
    %13 = vector.shape_cast %12 : vector<1x64x64xf32> to vector<64x64xf32>
    %14 = vector.broadcast %2 : vector<1x64xf32> to vector<64x64xf32>
    %15 = arith.mulf %13, %14 : vector<64x64xf32>
    %cst_10 = arith.constant dense<0.000000e+00> : vector<64xf32>
    %16 = vector.multi_reduction <add>, %15, %cst_10 [1] : vector<64x64xf32> to vector<64xf32>
    %17 = vector.shape_cast %16 : vector<64xf32> to vector<64x1xf32>
    %18 = vector.broadcast %11 : vector<1x1xf32> to vector<64x1xf32>
    %19 = arith.mulf %17, %18 : vector<64x1xf32>
    %20 = vector.shape_cast %19 : vector<64x1xf32> to vector<64x1xf32>
    %21 = vector.broadcast %20 : vector<64x1xf32> to vector<64x256xf32>
    %c1 = arith.constant 1 : index
    %c0_11 = arith.constant 0 : index
    %c0_12 = arith.constant 0 : index
    %22 = vector.load %arg2[%c1, %c0_11, %c0_12] : memref<2x1x64xf32, #tpu.memory_space<vmem>>, vector<1x1x64xf32>
    %23 = vector.shape_cast %22 : vector<1x1x64xf32> to vector<1x64xf32>
    %cst_13 = arith.constant dense<0.000000e+00> : vector<1xf32>
    %24 = vector.multi_reduction <add>, %23, %cst_13 [1] : vector<1x64xf32> to vector<1xf32>
    %25 = vector.shape_cast %24 : vector<1xf32> to vector<1x1xf32>
    %cst_14 = arith.constant 0.000000e+00 : f32
    %26 = vector.broadcast %cst_14 : f32 to vector<1x1xf32>
    %27 = arith.cmpf ogt, %25, %26 : vector<1x1xf32>
    %cst_15 = arith.constant 9.99999997E-7 : f32
    %28 = vector.broadcast %cst_15 : f32 to vector<1x1xf32>
    %29 = arith.maximumf %25, %28 : vector<1x1xf32>
    %30 = tpu.reciprocal %29 {approx = true} : vector<1x1xf32> -> vector<1x1xf32>
    %cst_16 = arith.constant 0.000000e+00 : f32
    %31 = vector.broadcast %cst_16 : f32 to vector<1x1xf32>
    %32 = arith.select %27, %30, %31 : vector<1x1xi1>, vector<1x1xf32>
    %c1_17 = arith.constant 1 : index
    %c0_18 = arith.constant 0 : index
    %c0_19 = arith.constant 0 : index
    %33 = vector.load %arg1[%c1_17, %c0_18, %c0_19] : memref<2x64x64xf32, #tpu.memory_space<vmem>>, vector<1x64x64xf32>
    %34 = vector.shape_cast %33 : vector<1x64x64xf32> to vector<64x64xf32>
    %35 = vector.broadcast %23 : vector<1x64xf32> to vector<64x64xf32>
    %36 = arith.mulf %34, %35 : vector<64x64xf32>
    %cst_20 = arith.constant dense<0.000000e+00> : vector<64xf32>
    %37 = vector.multi_reduction <add>, %36, %cst_20 [1] : vector<64x64xf32> to vector<64xf32>
    %38 = vector.shape_cast %37 : vector<64xf32> to vector<64x1xf32>
    %39 = vector.broadcast %32 : vector<1x1xf32> to vector<64x1xf32>
    %40 = arith.mulf %38, %39 : vector<64x1xf32>
    %41 = vector.shape_cast %40 : vector<64x1xf32> to vector<64x1xf32>
    %42 = vector.broadcast %41 : vector<64x1xf32> to vector<64x256xf32>
    %43 = tpu.concatenate %21, %42 in 1 : vector<64x256xf32>, vector<64x256xf32> -> vector<64x512xf32>
    %44 = arith.mulf %0, %43 : vector<64x512xf32>
    %cst_21 = arith.constant 0.000000e+00 : f32
    %45 = vector.broadcast %cst_21 : f32 to vector<64x512xf32>
    %46 = arith.maximumf %44, %45 : vector<64x512xf32>
    %47 = vector.extract_strided_slice %46 {offsets = [0, 0], sizes = [32, 512], strides = [1, 1]} : vector<64x512xf32> to vector<32x512xf32>
    %48 = vector.extract_strided_slice %46 {offsets = [32, 0], sizes = [32, 512], strides = [1, 1]} : vector<64x512xf32> to vector<32x512xf32>
    %c0_22 = arith.constant 0 : index
    %c0_23 = arith.constant 0 : index
    %c0_24 = arith.constant 0 : index
    %49 = vector.load %arg4[%c0_22, %c0_23, %c0_24] : memref<7x32x32xbf16, #tpu.memory_space<vmem>>, vector<1x32x32xbf16>
    %50 = vector.shape_cast %49 : vector<1x32x32xbf16> to vector<32x32xbf16>
    %51 = arith.truncf %47 : vector<32x512xf32> to vector<32x512xbf16>
    %cst_25 = arith.constant dense<0.000000e+00> : vector<32x512xf32>
    %52 = tpu.matmul %50, %51, %cst_25 {dimension_numbers = #tpu.dot_dimension_numbers<[1], [0], [0], [1], [0, 0, 1, 1], [], []>} : vector<32x32xbf16>, vector<32x512xbf16>, vector<32x512xf32> -> vector<32x512xf32>
    %c0_26 = arith.constant 0 : index
    %c0_27 = arith.constant 0 : index
    %c0_28 = arith.constant 0 : index
    %53 = vector.load %arg5[%c0_26, %c0_27, %c0_28] : memref<7x32x1xf32, #tpu.memory_space<vmem>>, vector<1x32x1xf32>
    %54 = vector.shape_cast %53 : vector<1x32x1xf32> to vector<32x1xf32>
    %55 = vector.broadcast %54 : vector<32x1xf32> to vector<32x512xf32>
    %56 = arith.addf %52, %55 : vector<32x512xf32>
    %cst_29 = arith.constant 0.000000e+00 : f32
    %57 = vector.broadcast %cst_29 : f32 to vector<32x512xf32>
    %58 = arith.maximumf %56, %57 : vector<32x512xf32>
    %c1_30 = arith.constant 1 : index
    %c0_31 = arith.constant 0 : index
    %c0_32 = arith.constant 0 : index
    %59 = vector.load %arg4[%c1_30, %c0_31, %c0_32] : memref<7x32x32xbf16, #tpu.memory_space<vmem>>, vector<1x32x32xbf16>
    %60 = vector.shape_cast %59 : vector<1x32x32xbf16> to vector<32x32xbf16>
    %61 = arith.truncf %58 : vector<32x512xf32> to vector<32x512xbf16>
    %cst_33 = arith.constant dense<0.000000e+00> : vector<32x512xf32>
    %62 = tpu.matmul %60, %61, %cst_33 {dimension_numbers = #tpu.dot_dimension_numbers<[1], [0], [0], [1], [0, 0, 1, 1], [], []>} : vector<32x32xbf16>, vector<32x512xbf16>, vector<32x512xf32> -> vector<32x512xf32>
    %c1_34 = arith.constant 1 : index
    %c0_35 = arith.constant 0 : index
    %c0_36 = arith.constant 0 : index
    %63 = vector.load %arg5[%c1_34, %c0_35, %c0_36] : memref<7x32x1xf32, #tpu.memory_space<vmem>>, vector<1x32x1xf32>
    %64 = vector.shape_cast %63 : vector<1x32x1xf32> to vector<32x1xf32>
    %65 = vector.broadcast %64 : vector<32x1xf32> to vector<32x512xf32>
    %66 = arith.addf %62, %65 : vector<32x512xf32>
    %cst_37 = arith.constant 0.000000e+00 : f32
    %67 = vector.broadcast %cst_37 : f32 to vector<32x512xf32>
    %68 = arith.maximumf %66, %67 : vector<32x512xf32>
    %c2 = arith.constant 2 : index
    %c0_38 = arith.constant 0 : index
    %c0_39 = arith.constant 0 : index
    %69 = vector.load %arg4[%c2, %c0_38, %c0_39] : memref<7x32x32xbf16, #tpu.memory_space<vmem>>, vector<1x32x32xbf16>
    %70 = vector.shape_cast %69 : vector<1x32x32xbf16> to vector<32x32xbf16>
    %71 = arith.truncf %68 : vector<32x512xf32> to vector<32x512xbf16>
    %cst_40 = arith.constant dense<0.000000e+00> : vector<32x512xf32>
    %72 = tpu.matmul %70, %71, %cst_40 {dimension_numbers = #tpu.dot_dimension_numbers<[1], [0], [0], [1], [0, 0, 1, 1], [], []>} : vector<32x32xbf16>, vector<32x512xbf16>, vector<32x512xf32> -> vector<32x512xf32>
    %c2_41 = arith.constant 2 : index
    %c0_42 = arith.constant 0 : index
    %c0_43 = arith.constant 0 : index
    %73 = vector.load %arg5[%c2_41, %c0_42, %c0_43] : memref<7x32x1xf32, #tpu.memory_space<vmem>>, vector<1x32x1xf32>
    %74 = vector.shape_cast %73 : vector<1x32x1xf32> to vector<32x1xf32>
    %75 = vector.broadcast %74 : vector<32x1xf32> to vector<32x512xf32>
    %76 = arith.addf %72, %75 : vector<32x512xf32>
    %cst_44 = arith.constant 0.000000e+00 : f32
    %77 = vector.broadcast %cst_44 : f32 to vector<32x512xf32>
    %78 = arith.maximumf %76, %77 : vector<32x512xf32>
    %c0_45 = arith.constant 0 : index
    %c0_46 = arith.constant 0 : index
    %79 = vector.load %arg6[%c0_45, %c0_46] : memref<48x512xf32, #tpu.memory_space<vmem>>, vector<32x512xf32>
    tpu.vector_store %arg6[%c0_45, %c0_46], %78 {strides = array<i32>} : memref<48x512xf32, #tpu.memory_space<vmem>>, vector<32x512xf32>,
    %c3 = arith.constant 3 : index
    %c0_47 = arith.constant 0 : index
    %c0_48 = arith.constant 0 : index
    %80 = vector.load %arg4[%c3, %c0_47, %c0_48] : memref<7x32x32xbf16, #tpu.memory_space<vmem>>, vector<1x32x32xbf16>
    %81 = vector.shape_cast %80 : vector<1x32x32xbf16> to vector<32x32xbf16>
    %82 = arith.truncf %78 : vector<32x512xf32> to vector<32x512xbf16>
    %cst_49 = arith.constant dense<0.000000e+00> : vector<32x512xf32>
    %83 = tpu.matmul %81, %82, %cst_49 {dimension_numbers = #tpu.dot_dimension_numbers<[1], [0], [0], [1], [0, 0, 1, 1], [], []>} : vector<32x32xbf16>, vector<32x512xbf16>, vector<32x512xf32> -> vector<32x512xf32>
    %c3_50 = arith.constant 3 : index
    %c0_51 = arith.constant 0 : index
    %c0_52 = arith.constant 0 : index
    %84 = vector.load %arg5[%c3_50, %c0_51, %c0_52] : memref<7x32x1xf32, #tpu.memory_space<vmem>>, vector<1x32x1xf32>
    %85 = vector.shape_cast %84 : vector<1x32x1xf32> to vector<32x1xf32>
    %86 = vector.broadcast %85 : vector<32x1xf32> to vector<32x512xf32>
    %87 = arith.addf %83, %86 : vector<32x512xf32>
    %88 = vector.extract_strided_slice %87 {offsets = [0, 0], sizes = [8, 512], strides = [1, 1]} : vector<32x512xf32> to vector<8x512xf32>
    %89 = math.exp %88 : vector<8x512xf32>
    %c0_53 = arith.constant 0 : index
    %c0_54 = arith.constant 0 : index
    %90 = vector.load %arg3[%c0_53, %c0_54] : memref<16x512xf32, #tpu.memory_space<vmem>>, vector<8x512xf32>
    %c8 = arith.constant 8 : index
    %c0_55 = arith.constant 0 : index
    %91 = vector.load %arg3[%c8, %c0_55] : memref<16x512xf32, #tpu.memory_space<vmem>>, vector<8x512xf32>
    %92 = arith.mulf %91, %89 : vector<8x512xf32>
    %93 = arith.addf %90, %92 : vector<8x512xf32>
    %c32 = arith.constant 32 : index
    %c0_56 = arith.constant 0 : index
    %94 = vector.load %arg6[%c32, %c0_56] : memref<48x512xf32, #tpu.memory_space<vmem>>, vector<8x512xf32>
    tpu.vector_store %arg6[%c32, %c0_56], %93 {strides = array<i32>} : memref<48x512xf32, #tpu.memory_space<vmem>>, vector<8x512xf32>,
    %c4 = arith.constant 4 : index
    %c0_57 = arith.constant 0 : index
    %c0_58 = arith.constant 0 : index
    %95 = vector.load %arg4[%c4, %c0_57, %c0_58] : memref<7x32x32xbf16, #tpu.memory_space<vmem>>, vector<1x32x32xbf16>
    %96 = vector.shape_cast %95 : vector<1x32x32xbf16> to vector<32x32xbf16>
    %97 = arith.truncf %48 : vector<32x512xf32> to vector<32x512xbf16>
    %cst_59 = arith.constant dense<0.000000e+00> : vector<32x512xf32>
    %98 = tpu.matmul %96, %97, %cst_59 {dimension_numbers = #tpu.dot_dimension_numbers<[1], [0], [0], [1], [0, 0, 1, 1], [], []>} : vector<32x32xbf16>, vector<32x512xbf16>, vector<32x512xf32> -> vector<32x512xf32>
    %c4_60 = arith.constant 4 : index
    %c0_61 = arith.constant 0 : index
    %c0_62 = arith.constant 0 : index
    %99 = vector.load %arg5[%c4_60, %c0_61, %c0_62] : memref<7x32x1xf32, #tpu.memory_space<vmem>>, vector<1x32x1xf32>
    %100 = vector.shape_cast %99 : vector<1x32x1xf32> to vector<32x1xf32>
    %101 = vector.broadcast %100 : vector<32x1xf32> to vector<32x512xf32>
    %102 = arith.addf %98, %101 : vector<32x512xf32>
    %cst_63 = arith.constant 0.000000e+00 : f32
    %103 = vector.broadcast %cst_63 : f32 to vector<32x512xf32>
    %104 = arith.maximumf %102, %103 : vector<32x512xf32>
    %105 = arith.addf %104, %78 : vector<32x512xf32>
    %c5 = arith.constant 5 : index
    %c0_64 = arith.constant 0 : index
    %c0_65 = arith.constant 0 : index
    %106 = vector.load %arg4[%c5, %c0_64, %c0_65] : memref<7x32x32xbf16, #tpu.memory_space<vmem>>, vector<1x32x32xbf16>
    %107 = vector.shape_cast %106 : vector<1x32x32xbf16> to vector<32x32xbf16>
    %108 = arith.truncf %105 : vector<32x512xf32> to vector<32x512xbf16>
    %cst_66 = arith.constant dense<0.000000e+00> : vector<32x512xf32>
    %109 = tpu.matmul %107, %108, %cst_66 {dimension_numbers = #tpu.dot_dimension_numbers<[1], [0], [0], [1], [0, 0, 1, 1], [], []>} : vector<32x32xbf16>, vector<32x512xbf16>, vector<32x512xf32> -> vector<32x512xf32>
    %c5_67 = arith.constant 5 : index
    %c0_68 = arith.constant 0 : index
    %c0_69 = arith.constant 0 : index
    %110 = vector.load %arg5[%c5_67, %c0_68, %c0_69] : memref<7x32x1xf32, #tpu.memory_space<vmem>>, vector<1x32x1xf32>
    %111 = vector.shape_cast %110 : vector<1x32x1xf32> to vector<32x1xf32>
    %112 = vector.broadcast %111 : vector<32x1xf32> to vector<32x512xf32>
    %113 = arith.addf %109, %112 : vector<32x512xf32>
    %cst_70 = arith.constant 0.000000e+00 : f32
    %114 = vector.broadcast %cst_70 : f32 to vector<32x512xf32>
    %115 = arith.maximumf %113, %114 : vector<32x512xf32>
    %c6 = arith.constant 6 : index
    %c0_71 = arith.constant 0 : index
    %c0_72 = arith.constant 0 : index
    %116 = vector.load %arg4[%c6, %c0_71, %c0_72] : memref<7x32x32xbf16, #tpu.memory_space<vmem>>, vector<1x32x32xbf16>
    %117 = vector.shape_cast %116 : vector<1x32x32xbf16> to vector<32x32xbf16>
    %118 = arith.truncf %115 : vector<32x512xf32> to vector<32x512xbf16>
    %cst_73 = arith.constant dense<0.000000e+00> : vector<32x512xf32>
    %119 = tpu.matmul %117, %118, %cst_73 {dimension_numbers = #tpu.dot_dimension_numbers<[1], [0], [0], [1], [0, 0, 1, 1], [], []>} : vector<32x32xbf16>, vector<32x512xbf16>, vector<32x512xf32> -> vector<32x512xf32>
    %c6_74 = arith.constant 6 : index
    %c0_75 = arith.constant 0 : index
    %c0_76 = arith.constant 0 : index
    %120 = vector.load %arg5[%c6_74, %c0_75, %c0_76] : memref<7x32x1xf32, #tpu.memory_space<vmem>>, vector<1x32x1xf32>
    %121 = vector.shape_cast %120 : vector<1x32x1xf32> to vector<32x1xf32>
    %122 = vector.broadcast %121 : vector<32x1xf32> to vector<32x512xf32>
    %123 = arith.addf %119, %122 : vector<32x512xf32>
    %124 = vector.extract_strided_slice %123 {offsets = [0, 0], sizes = [8, 512], strides = [1, 1]} : vector<32x512xf32> to vector<8x512xf32>
    %c40 = arith.constant 40 : index
    %c0_77 = arith.constant 0 : index
    %125 = vector.load %arg6[%c40, %c0_77] : memref<48x512xf32, #tpu.memory_space<vmem>>, vector<8x512xf32>
    tpu.vector_store %arg6[%c40, %c0_77], %124 {strides = array<i32>} : memref<48x512xf32, #tpu.memory_space<vmem>>, vector<8x512xf32>,
    return
  }
}

</mosaic_0001>

<bundles_post_ra>
// kernel: tpu_custom_call.1
= control target key start
LH: loop header
LB: loop body
LE: loop exit
PB: predicated region body
PF: predicated region fallthrough
CT: control target
= control target key end

     0   :  { %11 = vsyncpa [#allocation3], 0  ;;  %s2240_s0 = inlined_call_operand.hbm [shape: f32[64,512], index: 0, kind: input, shape index: {}]   ;;  %s2241_s1 = inlined_call_operand.vmem [shape: f32[2,64,64], index: 1, kind: input, shape index: {}]   ;;  %s2242_s2 = inlined_call_operand.vmem [shape: f32[2,1,64], index: 2, kind: input, shape index: {}]   ;;  %s2243_s3 = inlined_call_operand.hbm [shape: f32[16,512], index: 3, kind: input, shape index: {}]   ;;  %s2244_s4 = inlined_call_operand.vmem [shape: bf16[7,32,32], index: 4, kind: input, shape index: {}]   ;;  %s2245_s5 = inlined_call_operand.vmem [shape: f32[7,32,1], index: 5, kind: input, shape index: {}]   ;;  %s2246_s6 = inlined_call_operand.hbm [shape: f32[48,512], index: 6, kind: output, shape index: {}]  }
   0x1   :  { %12 = vsyncpa [#allocation6], 0 }
   0x2   :  { %13 = vsyncpa [#allocation4], 0  ;;  %s1741_s21 = smov [#allocation2]   ;;  %s1669_s25 = scalar_lea.hbm %s2240_s0, 4096 }
   0x3   :  { %s19_s22 = sshll.u32 %s1741_s21, 4  ;;  %p1670_p0 = scmp.ne.s32.totalorder %s2240_s0, %s1669_s25  ;;  %s20_s22 = int_to_ptr.vmem [resolvable:$true] %s19_s22 }
   0x4   :  { %p1673_p1 = scmp.lt.u32.totalorder %s1669_s25, %s2240_s0 }
   0x6   :  { %p1675_p2 = pnand %p1673_p1, %p1670_p0 }
   0x8   :  { %1678 = shalt.err (!%p1675_p2)
}
   0x9   :  { %s1679_s30 = scalar_lea.vmem %s20_s22, 4096  ;;  %p1684_p4 = scmp.lt.s32.totalorder %s20_s22, %s20_s22 }
   0xa   :  { %p1680_p3 = scmp.ne.s32.totalorder %s20_s22, %s1679_s30  ;;  %p1685_p5 = scmp.lt.s32.totalorder %s1679_s30, %s1679_s30 }
   0xc   :  { %p1686_p6 = por %p1685_p5, %p1684_p4 }
   0xe   :  { %p1687_p7 = pnand %p1686_p6, %p1680_p3 }
  0x10   :  { %1690 = shalt.err (!%p1687_p7)
}
  0x11   :  { %s1742_s7 = smov 512   ;;  %s1743_s8 = smov 32  }
  0x12   :  { %25 = dma.hbm_to_vmem [thread:$0]  %s2240_s0, 4096, %s20_s22, [#allocation3], %s1742_s7, %s1742_s7, %s1743_s8  }
  0x13   :  { %s1744_s11 = smov [#allocation5]   ;;  %s1691_s15 = scalar_lea.hbm %s2243_s3, 1024 }
  0x14   :  { %s35_s12 = sshll.u32 %s1744_s11, 4  ;;  %p1692_p8 = scmp.ne.s32.totalorder %s2243_s3, %s1691_s15  ;;  %s36_s12 = int_to_ptr.vmem [resolvable:$true] %s35_s12 }
  0x15   :  { %p1695_p9 = scmp.lt.u32.totalorder %s1691_s15, %s2243_s3 }
  0x17   :  { %p1697_p10 = pnand %p1695_p9, %p1692_p8 }
  0x19   :  { %1700 = shalt.err (!%p1697_p10)
}
  0x1a   :  { %s1701_s20 = scalar_lea.vmem %s36_s12, 1024  ;;  %p1706_p12 = scmp.lt.s32.totalorder %s36_s12, %s36_s12 }
  0x1b   :  { %p1702_p11 = scmp.ne.s32.totalorder %s36_s12, %s1701_s20  ;;  %p1707_p13 = scmp.lt.s32.totalorder %s1701_s20, %s1701_s20 }
  0x1d   :  { %p1708_p0 = por %p1707_p13, %p1706_p12 }
  0x1f   :  { %p1709_p1 = pnand %p1708_p0, %p1702_p11 }
  0x21   :  { %1712 = shalt.err (!%p1709_p1)
}
  0x22   :  { %41 = dma.hbm_to_vmem [thread:$0]  %s2243_s3, 1024, %s36_s12, [#allocation6], %s1742_s7, %s1742_s7, %s1743_s8  }
  0x23   :  { %1735 = dma.done.wait [#allocation3], 4096  }
  0x24   :  { %1736 = vsyncadd [#allocation3], 4294963200 }
  0x25   :  { %1737 = dma.done.wait [#allocation6], 1024  }
  0x26   :  { %1738 = vsyncadd [#allocation6], 4294966272  ;;  %v103_v0 = vlaneseq  ;;  %v1745_v1 = vmov 0   ;;  %vm86_vm0 = vcmask 516096   ;;  %v85_v4 = vld [vmem:[%s2242_s2] sm:$0x1] }
  0x27   :  { %1642 = vset.pattern.permute.xlu1 %v1745_v1  ;;  %1641 = vset.pattern.permute.xlu0 %v1745_v1  ;;  %v94_v5 = vld [vmem:[%s2241_s1] sm:$0xff]  ;;  %v87_v7 = vsel %vm86_vm0, %v85_v4, 0.0  ;;  %v95_v10 = vld [vmem:[%s2241_s1 + $0x8] sm:$0xff]  ;;  %vm116_vm1 = vcmask 523264   ;;  %v96_v13 = vld [vmem:[%s2241_s1 + $0x10] sm:$0xff]  ;;  %vm331_vm4 = vcmask 261120  }
  0x28   :  { %v104_v2 = vshrl.u32 %v103_v0, 7  ;;  %370 = vmatprep.mubr.bf16.mxu0 %v1745_v1  ;;  %423 = vmatprep.mubr.bf16.mxu1 %v1745_v1  ;;  %v1536_v6 = vld [vmem:[%s2242_s2 + $0x1] sm:$0x1]  ;;  %v1538_v12 = vld [vmem:[%s2241_s1 + $0x48] sm:$0xff]  ;;  %v97_v18 = vld [vmem:[%s2241_s1 + $0x18] sm:$0xff]  ;;  %s1746_s24 = smov [#allocation7]  }
  0x29   :  { %v1537_v11 = vld [vmem:[%s2241_s1 + $0x40] sm:$0xff]  ;;  %88 = vadd.xlane.f32.xlu0 %v87_v7  ;;  %v155_v15 = vsel %vm86_vm0, %v1536_v6, 0.0  ;;  %v1539_v22 = vld [vmem:[%s2241_s1 + $0x50] sm:$0xff]  ;;  %v1540_v23 = vld [vmem:[%s2241_s1 + $0x58] sm:$0xff]  ;;  %s1523_s25 = sshll.u32 %s1746_s24, 4  ;;  %s1524_s25 = int_to_ptr.vmem [resolvable:$true] %s1523_s25 }
  0x2a   :  { %v1816_v3 = vsub.s32 0, %v104_v2  ;;  %v99_v30 = vld [vmem:[%s2241_s1 + $0x28] sm:$0xff]  ;;  %v1541_v31 = vld [vmem:[%s2241_s1 + $0x60] sm:$0xff]  ;;  %v100_v32 = vld [vmem:[%s2241_s1 + $0x30] sm:$0xff]  ;;  %p1718_p3 = scmp.lt.s32.totalorder %s1524_s25, %s1524_s25 }
  0x2b   :  { %v1543_v37 = vld [vmem:[%s2241_s1 + $0x70] sm:$0xff]  ;;  %v98_v38 = vld [vmem:[%s2241_s1 + $0x20] sm:$0xff]  ;;  %v1542_v39 = vld [vmem:[%s2241_s1 + $0x68] sm:$0xff] }
  0x2c   :  { %v106_v8 = vrot.slane %v85_v4, %v1816_v3  ;;  %v175_v9 = vrot.slane %v1536_v6, %v1816_v3  ;;  %v101_v44 = vld [vmem:[%s2241_s1 + $0x38] sm:$0xff]  ;;  %v298_v58 = vld [vmem:[%s2245_s5 + $0x8] sm:$0xff]  ;;  %v297_v59 = vld [vmem:[%s2245_s5] sm:$0xff] }
  0x2d   :  { %156 = vadd.xlane.f32.xlu0 %v155_v15  ;;  %v1544_v45 = vld [vmem:[%s2241_s1 + $0x78] sm:$0xff]  ;;  %v299_v60 = vld [vmem:[%s2245_s5 + $0x10] sm:$0xff]  ;;  %v1570_v61 = vld [vmem:[%s2245_s5 + $0x48] sm:$0xff] }
  0x2e   :  { %v108_v14 = vmul.f32 %v106_v8, %v94_v5  ;;  %v109_v16 = vmul.f32 %v106_v8, %v95_v10  ;;  %v177_v17 = vmul.f32 %v1537_v11, %v175_v9  ;;  %v178_v19 = vmul.f32 %v1538_v12, %v175_v9  ;;  %v300_v62 = vld [vmem:[%s2245_s5 + $0x18] sm:$0xff]  ;;  %v1555_v0 = vld [vmem:[%s2245_s5 + $0x20] sm:$0xff]  ;;  %v1556_v2 = vld [vmem:[%s2245_s5 + $0x28] sm:$0xff] }
  0x2f   :  { %v110_v21 = vmul.f32 %v106_v8, %v96_v13  ;;  %v111_v24 = vmul.f32 %v106_v8, %v97_v18  ;;  %v179_v28 = vmul.f32 %v1539_v22, %v175_v9  ;;  %v180_v29 = vmul.f32 %v1540_v23, %v175_v9  ;;  %v1572_v63 = vld [vmem:[%s2245_s5 + $0x58] sm:$0xff]  ;;  %v1557_v4 = vld [vmem:[%s2245_s5 + $0x30] sm:$0xff]  ;;  %v1569_v6 = vld [vmem:[%s2245_s5 + $0x40] sm:$0xff] }
  0x30   :  { %v117_v20 = vsel %vm116_vm1, %v108_v14, 0.0  ;;  %v120_v25 = vsel %vm116_vm1, %v109_v16, 0.0  ;;  %v185_v26 = vsel %vm116_vm1, %v177_v17, 0.0  ;;  %v188_v27 = vsel %vm116_vm1, %v178_v19, 0.0  ;;  %v1558_v5 = vld [vmem:[%s2245_s5 + $0x38] sm:$0xff]  ;;  %v1571_v7 = vld [vmem:[%s2245_s5 + $0x50] sm:$0xff] }
  0x31   :  { %118 = vadd.xlane.f32.xlu1 %v117_v20  ;;  %v123_v33 = vsel %vm116_vm1, %v110_v21, 0.0  ;;  %v113_v34 = vmul.f32 %v106_v8, %v99_v30  ;;  %v181_v35 = vmul.f32 %v1541_v31, %v175_v9  ;;  %v114_v36 = vmul.f32 %v106_v8, %v100_v32  ;;  %186 = vadd.xlane.f32.xlu0 %v185_v26  ;;  %v1598_v10 = vld [vmem:[%s2245_s5 + $0x88] sm:$0xff]  ;;  %v1599_v12 = vld [vmem:[%s2245_s5 + $0x90] sm:$0xff]  ;;  %v1614_v13 = vld [vmem:[%s2245_s5 + $0xb8] sm:$0xff] }
  0x32   :  { %v126_v40 = vsel %vm116_vm1, %v111_v24, 0.0  ;;  %v183_v41 = vmul.f32 %v1543_v37, %v175_v9  ;;  %v112_v42 = vmul.f32 %v106_v8, %v98_v38  ;;  %v182_v43 = vmul.f32 %v1542_v39, %v175_v9  ;;  %v1612_v11 = vld [vmem:[%s2245_s5 + $0xa8] sm:$0xff]  ;;  %v1611_v14 = vld [vmem:[%s2245_s5 + $0xa0] sm:$0xff]  ;;  %v1613_v18 = vld [vmem:[%s2245_s5 + $0xb0] sm:$0xff] }
  0x33   :  { %v132_v46 = vsel %vm116_vm1, %v113_v34, 0.0  ;;  %v197_v47 = vsel %vm116_vm1, %v181_v35, 0.0  ;;  %v135_v48 = vsel %vm116_vm1, %v114_v36, 0.0  ;;  %v115_v49 = vmul.f32 %v106_v8, %v101_v44  ;;  %v1597_v8 = vld [vmem:[%s2245_s5 + $0x80] sm:$0xff]  ;;  %v54_v38 = vld [vmem:[#allocation2 + $0x8] sm:$0xff] }
  0x34   :  { %v203_v50 = vsel %vm116_vm1, %v183_v41, 0.0  ;;  %v129_v51 = vsel %vm116_vm1, %v112_v42, 0.0  ;;  %v200_v52 = vsel %vm116_vm1, %v182_v43, 0.0  ;;  %v184_v53 = vmul.f32 %v1544_v45, %v175_v9  ;;  %v1600_v9 = vld [vmem:[%s2245_s5 + $0x98] sm:$0xff]  ;;  %v1625_v15 = vld [vmem:[%s2245_s5 + $0xc0] sm:$0xff]  ;;  %v62_v41 = vld [vmem:[#allocation2 + $0x48] sm:$0xff] }
  0x35   :  { %121 = vadd.xlane.f32.xlu1 %v120_v25  ;;  %v191_v54 = vsel %vm116_vm1, %v179_v28, 0.0  ;;  %v138_v55 = vsel %vm116_vm1, %v115_v49, 0.0  ;;  %124 = vadd.xlane.f32.xlu0 %v123_v33  ;;  %v194_v56 = vsel %vm116_vm1, %v180_v29, 0.0  ;;  %v1583_v22 = vld [vmem:[%s2245_s5 + $0x60] sm:$0xff] }
  0x36   :  { %v206_v57 = vsel %vm116_vm1, %v184_v53, 0.0  ;;  %v53_v30 = vld [vmem:[#allocation2] sm:$0xff] }
  0x37   :  { %v57_v31 = vld [vmem:[#allocation2 + $0x20] sm:$0xff] }
  0x38   :  { %v65_v45 = vld [vmem:[#allocation2 + $0x60] sm:$0xff] }
  0x39   :  { %189 = vadd.xlane.f32.xlu1 %v188_v27  ;;  %192 = vadd.xlane.f32.xlu0 %v191_v54  ;;  %v61_v54 = vld [vmem:[#allocation2 + $0x40] sm:$0xff] }
  0x3d   :  { %127 = vadd.xlane.f32.xlu1 %v126_v40  ;;  %v66_v40 = vld [vmem:[#allocation2 + $0x68] sm:$0xff] }
  0x41   :  { %195 = vadd.xlane.f32.xlu1 %v194_v56  ;;  %v58_v56 = vld [vmem:[#allocation2 + $0x28] sm:$0xff] }
  0x4f   :  { %303 = vperm.xlu0 %1641, %v297_v59  }
  0x52   :  { %308 = vperm.xlu1 %1642, %v298_v58  }
  0x53   :  { %661 = vperm.xlu0 %1641, %v1570_v61  }
  0x56   :  { %313 = vperm.xlu1 %1642, %v299_v60  }
  0x57   :  { %671 = vperm.xlu0 %1641, %v1572_v63   ;;  %v64_v63 = vld [vmem:[#allocation2 + $0x58] sm:$0xff] }
  0x5a   :  { %318 = vperm.xlu1 %1642, %v300_v62  }
  0x5e   :  { %480 = vperm.xlu1 %1642, %v1555_v0  }
  0x62   :  { %485 = vperm.xlu1 %1642, %v1556_v2   ;;  %v56_v2 = vld [vmem:[#allocation2 + $0x18] sm:$0xff] }
  0x66   :  { %490 = vperm.xlu1 %1642, %v1557_v4  }
  0x6a   :  { %495 = vperm.xlu1 %1642, %v1558_v5  }
  0x6e   :  { %656 = vperm.xlu1 %1642, %v1569_v6  }
  0x72   :  { %666 = vperm.xlu1 %1642, %v1571_v7   ;;  %v60_v7 = vld [vmem:[#allocation2 + $0x38] sm:$0xff] }
  0x76   :  { %133 = vadd.xlane.f32.xlu0 %v132_v46  ;;  %v59_v46 = vld [vmem:[#allocation2 + $0x30] sm:$0xff] }
  0x7a   :  { %198 = vadd.xlane.f32.xlu0 %v197_v47  ;;  %v55_v47 = vld [vmem:[#allocation2 + $0x10] sm:$0xff] }
  0x7e   :  { %136 = vadd.xlane.f32.xlu0 %v135_v48 }
  0x82   :  { %204 = vadd.xlane.f32.xlu0 %v203_v50 }
  0x96   :  { %130 = vadd.xlane.f32.xlu1 %v129_v51 }
  0x98   :  { %1021 = vperm.xlu0 %1641, %v1597_v8  }
  0x9a   :  { %201 = vadd.xlane.f32.xlu1 %v200_v52 }
  0x9c   :  { %1036 = vperm.xlu0 %1641, %v1600_v9  }
  0x9e   :  { %139 = vadd.xlane.f32.xlu1 %v138_v55 }
  0xa0   :  { %1218 = vperm.xlu0 %1641, %v1612_v11   ;;  %v67_v11 = vld [vmem:[#allocation2 + $0x70] sm:$0xff] }
  0xa2   :  { %207 = vadd.xlane.f32.xlu1 %v206_v57 }
  0xa4   :  { %1228 = vperm.xlu0 %1641, %v1614_v13   ;;  %v63_v13 = vld [vmem:[#allocation2 + $0x50] sm:$0xff] }
  0xa8   :  { %1389 = vperm.xlu0 %1641, %v1625_v15  }
  0xb3   :  { %1026 = vperm.xlu1 %1642, %v1598_v10  }
  0xb6   :  { %v89_v16 = vpop.xlane.xlu0 %88 }
  0xb7   :  { %1031 = vperm.xlu1 %1642, %v1599_v12   ;;  %v91_v17 = vmax.f32 %v89_v16, 1e-06  ;;  %vm90_vm2 = vcmp.gt.f32.partialorder %v89_v16, 0.0 }
  0xb9   :  { %1657 = vrcp.f32 %v91_v17 }
  0xba   :  { %v157_v20 = vpop.xlane.xlu0 %156 }
  0xbb   :  { %1213 = vperm.xlu1 %1642, %v1611_v14   ;;  %v159_v21 = vmax.f32 %v157_v20, 1e-06  ;;  %vm158_vm3 = vcmp.gt.f32.partialorder %v157_v20, 0.0 }
  0xbd   :  { %1659 = vrcp.f32 %v159_v21 }
  0xbe   :  { %v119_v19 = vpop.xlane.xlu1 %118  ;;  %v187_v24 = vpop.xlane.xlu0 %186 }
  0xbf   :  { %1223 = vperm.xlu1 %1642, %v1613_v18  }
  0xc2   :  { %v122_v23 = vpop.xlane.xlu1 %121  ;;  %v125_v28 = vpop.xlane.xlu0 %124 }
  0xc3   :  { %848 = vperm.xlu1 %1642, %v1583_v22   ;;  %v1658_v26 = vpop.eup %1657 }
  0xc4   :  { %v93_v27 = vsel %vm90_vm2, %v1658_v26, 0.0 }
  0xc5   :  { %v1957_v29 = vrot.slane %v93_v27, %v1816_v3 }
  0xc6   :  { %v190_v25 = vpop.xlane.xlu1 %189  ;;  %v193_v49 = vpop.xlane.xlu0 %192 }
  0xc7   :  { %v1660_v33 = vpop.eup %1659  ;;  %v145_v34 = vmul.f32 %v1957_v29, %v119_v19  ;;  %v146_v35 = vmul.f32 %v1957_v29, %v122_v23  ;;  %v147_v37 = vmul.f32 %v1957_v29, %v125_v28 }
  0xc8   :  { %v161_v39 = vsel %vm158_vm3, %v1660_v33, 0.0 }
  0xc9   :  { %v221_v42 = vmul.f32 %v145_v34, %v53_v30  ;;  %v1964_v43 = vrot.slane %v161_v39, %v1816_v3  ;;  %v225_v44 = vmul.f32 %v146_v35, %v57_v31  ;;  %v222_v50 = vmul.f32 %v145_v34, %v54_v38  ;;  %v68_v3 = vld [vmem:[#allocation2 + $0x78] sm:$0xff]  ;;  %v1644_v39 = vld [vmem:[%s2244_s4 + $0x8] sm:$0xff]  }
  0xca   :  { %v128_v32 = vpop.xlane.xlu1 %127  ;;  %v230_v55 = vmul.f32 %v147_v37, %v62_v41  ;;  %v229_v4 = vmul.f32 %v147_v37, %v61_v54  ;;  %v226_v5 = vmul.f32 %v146_v35, %v58_v56  ;;  %v1643_v37 = vld [vmem:[%s2244_s4] sm:$0xff]  }
  0xcb   :  { %v148_v36 = vmul.f32 %v1957_v29, %v128_v32  ;;  %v214_v51 = vmul.f32 %v1964_v43, %v190_v25  ;;  %v213_v52 = vmul.f32 %v1964_v43, %v187_v24  ;;  %v253_v57 = vmax.f32 %v221_v42, 0.0 }
  0xcc   :  { %v257_v58 = vmax.f32 %v225_v44, 0.0  ;;  %v215_v0 = vmul.f32 %v1964_v43, %v193_v49  ;;  %v254_v6 = vmax.f32 %v222_v50, 0.0  ;;  %v262_v10 = vmax.f32 %v230_v55, 0.0 }
  0xcd   :  { %v234_v53 = vmul.f32 %v148_v36, %v66_v40  ;;  %v233_v59 = vmul.f32 %v148_v36, %v65_v45  ;;  %v227_v60 = vmul.f32 %v214_v51, %v59_v46  ;;  %v223_v61 = vmul.f32 %v213_v52, %v55_v47 }
  0xce   :  { %v196_v48 = vpop.xlane.xlu1 %195  ;;  %v232_v15 = vmul.f32 %v215_v0, %v64_v63  ;;  %v258_v16 = vmax.f32 %v226_v5, 0.0  ;;  %v224_v17 = vmul.f32 %v213_v52, %v56_v2  ;;  %v289_v19 = vpack.c.bf16 %v257_v58, %v253_v57  ;;  %v304_v41 = vpop.permute.xlu0 %303 }
  0xcf   :  { %v216_v62 = vmul.f32 %v1964_v43, %v196_v48  ;;  %v259_v8 = vmax.f32 %v227_v60, 0.0  ;;  %v266_v9 = vmax.f32 %v234_v53, 0.0  ;;  %v255_v14 = vmax.f32 %v223_v61, 0.0 }
  0xd0   :  { %v265_v18 = vmax.f32 %v233_v59, 0.0  ;;  %v228_v20 = vmul.f32 %v214_v51, %v60_v7  ;;  %v231_v22 = vmul.f32 %v215_v0, %v63_v13  ;;  %v290_v23 = vpack.c.bf16 %v258_v16, %v254_v6 }
  0xd1   :  { %v236_v12 = vmul.f32 %v216_v62, %v68_v3  ;;  %v235_v21 = vmul.f32 %v216_v62, %v67_v11  ;;  %v256_v24 = vmax.f32 %v224_v17, 0.0  ;;  %v261_v25 = vmax.f32 %v229_v4, 0.0 }
  0xd2   :  { %v264_v27 = vmax.f32 %v232_v15, 0.0  ;;  %v260_v28 = vmax.f32 %v228_v20, 0.0  ;;  %338 = vmatprep.subr.bf16.mxu0 %v290_v23  ;;  %v294_v30 = vpack.c.bf16 %v266_v9, %v262_v10  ;;  %v291_v31 = vpack.c.bf16 %v259_v8, %v255_v14  ;;  %v309_v40 = vpop.permute.xlu1 %308 }
  0xd3   :  { %v268_v26 = vmax.f32 %v236_v12, 0.0  ;;  %339 = vmatpush1.bf16.msra.mxu0 %v289_v19  ;;  %v267_v33 = vmax.f32 %v235_v21, 0.0  ;;  %v263_v34 = vmax.f32 %v231_v22, 0.0  ;;  %v293_v35 = vpack.c.bf16 %v265_v18, %v261_v25 }
  0xd4   :  { %v292_v32 = vpack.c.bf16 %v260_v28, %v256_v24  ;;  %340 = vmatprep.subr.bf16.mxu0 %v294_v30 }
  0xd5   :  { %v296_v36 = vpack.c.bf16 %v268_v26, %v264_v27  ;;  %v295_v38 = vpack.c.bf16 %v267_v33, %v263_v34 }
  0xd6   :  { %391 = vmatprep.subr.bf16.mxu1 %v292_v32  ;;  %v314_v52 = vpop.permute.xlu1 %313 }
  0xd7   :  { %392 = vmatpush1.bf16.msra.mxu1 %v291_v31  ;;  %341 = vmatpush1.bf16.msra.mxu0 %v293_v35 }
  0xd8   :  { %393 = vmatprep.subr.bf16.mxu1 %v296_v36 }
  0xda   :  { %1547 = vmatmul.mubr.msk.bf16.vlgmr.msra.gmra.mrb[0].mxu0 %vm331_vm4, %v1643_v37  ;;  %v319_v10 = vpop.permute.xlu1 %318 }
  0xdb   :  { %394 = vmatpush1.bf16.msra.mxu1 %v295_v38  ;;  %380 = vmatprep.mubr.bf16.mxu0 %v1745_v1  ;;  %v1645_v38 = vld [vmem:[%s2244_s4 + $0x10] sm:$0xff]  }
  0xde   :  { %1549 = vmatmul.mubr.msk.bf16.vlgmr.msra.gmra.mrb[0].mxu1 %vm331_vm4, %v1643_v37 }
  0xdf   :  { %433 = vmatprep.mubr.bf16.mxu1 %v1745_v1 }
  0xe2   :  { %1548 = vmatmul.mubr.msk.bf16.gmra.mrb[4].mxu0 %vm331_vm4, %v1644_v39 }
  0xe3   :  { %546 = vmatprep.mubr.bf16.mxu0 %v1745_v1 }
  0xe6   :  { %1550 = vmatmul.mubr.msk.bf16.gmra.mrb[4].mxu1 %vm331_vm4, %v1644_v39 }
  0xe7   :  { %599 = vmatprep.mubr.bf16.mxu1 %v1745_v1 }
 0x1ad   :  { %v372_v42 = vpop.f32.mrb[0].mxu0 }
 0x1ae   :  { %v373_v44 = vadd.f32 %v372_v42, %v304_v41  ;;  %v374_v45 = vpop.f32.mrb[1].mxu0 }
 0x1af   :  { %v375_v46 = vadd.f32 %v374_v45, %v304_v41  ;;  %v376_v47 = vpop.f32.mrb[2].mxu0 }
 0x1b0   :  { %v444_v48 = vmax.f32 %v373_v44, 0.0  ;;  %v377_v49 = vadd.f32 %v376_v47, %v309_v40  ;;  %v378_v50 = vpop.f32.mrb[3].mxu0 }
 0x1b1   :  { %v425_v51 = vpop.f32.mrb[0].mxu1  ;;  %v445_v53 = vmax.f32 %v375_v46, 0.0  ;;  %v379_v54 = vadd.f32 %v378_v50, %v309_v40 }
 0x1b2   :  { %v426_v55 = vadd.f32 %v425_v51, %v304_v41  ;;  %v427_v56 = vpop.f32.mrb[1].mxu1  ;;  %v448_v57 = vmax.f32 %v377_v49, 0.0 }
 0x1b3   :  { %v428_v58 = vadd.f32 %v427_v56, %v304_v41  ;;  %v429_v59 = vpop.f32.mrb[2].mxu1  ;;  %v449_v3 = vmax.f32 %v379_v54, 0.0  ;;  %v481_v41 = vpop.permute.xlu1 %480 }
 0x1b4   :  { %v430_v60 = vadd.f32 %v429_v59, %v309_v40  ;;  %v431_v61 = vpop.f32.mrb[3].mxu1  ;;  %v465_v62 = vpack.c.bf16 %v448_v57, %v444_v48  ;;  %v446_v2 = vmax.f32 %v426_v55, 0.0 }
 0x1b5   :  { %v432_v63 = vadd.f32 %v431_v61, %v309_v40  ;;  %v466_v0 = vpack.c.bf16 %v449_v3, %v445_v53  ;;  %v382_v5 = vpop.f32.mrb[4].mxu0  ;;  %v447_v6 = vmax.f32 %v428_v58, 0.0  ;;  %v1646_v40 = vld [vmem:[%s2244_s4 + $0x18] sm:$0xff]  }
 0x1b6   :  { %v450_v4 = vmax.f32 %v430_v60, 0.0  ;;  %v383_v8 = vadd.f32 %v382_v5, %v314_v52  ;;  %v384_v9 = vpop.f32.mrb[5].mxu0 }
 0x1b7   :  { %v451_v7 = vmax.f32 %v432_v63, 0.0  ;;  %v385_v12 = vadd.f32 %v384_v9, %v314_v52  ;;  %v386_v13 = vpop.f32.mrb[6].mxu0  ;;  %514 = vmatprep.subr.bf16.mxu0 %v466_v0  ;;  %v486_v42 = vpop.permute.xlu1 %485 }
 0x1b8   :  { %v467_v11 = vpack.c.bf16 %v450_v4, %v446_v2  ;;  %v387_v15 = vadd.f32 %v386_v13, %v319_v10  ;;  %v388_v16 = vpop.f32.mrb[7].mxu0  ;;  %515 = vmatpush1.bf16.msra.mxu0 %v465_v62  ;;  %v452_v21 = vmax.f32 %v383_v8, 0.0 }
 0x1b9   :  { %v468_v14 = vpack.c.bf16 %v451_v7, %v447_v6  ;;  %v435_v17 = vpop.f32.mrb[4].mxu1  ;;  %v389_v18 = vadd.f32 %v388_v16, %v319_v10  ;;  %v453_v25 = vmax.f32 %v385_v12, 0.0 }
 0x1ba   :  { %v436_v19 = vadd.f32 %v435_v17, %v314_v52  ;;  %v437_v20 = vpop.f32.mrb[5].mxu1  ;;  %v456_v22 = vmax.f32 %v387_v15, 0.0 }
 0x1bb   :  { %v438_v23 = vadd.f32 %v437_v20, %v314_v52  ;;  %v439_v24 = vpop.f32.mrb[6].mxu1  ;;  %567 = vmatprep.subr.bf16.mxu1 %v468_v14  ;;  %v457_v26 = vmax.f32 %v389_v18, 0.0  ;;  %v491_v52 = vpop.permute.xlu1 %490 }
 0x1bc   :  { %v440_v27 = vadd.f32 %v439_v24, %v319_v10  ;;  %v441_v28 = vpop.f32.mrb[7].mxu1  ;;  %568 = vmatpush1.bf16.msra.mxu1 %v467_v11  ;;  %v469_v30 = vpack.c.bf16 %v456_v22, %v452_v21  ;;  %v454_v33 = vmax.f32 %v436_v19, 0.0 }
 0x1bd   :  { %v442_v31 = vadd.f32 %v441_v28, %v319_v10  ;;  %v470_v32 = vpack.c.bf16 %v457_v26, %v453_v25  ;;  %v455_v35 = vmax.f32 %v438_v23, 0.0 }
 0x1be   :  { %v458_v34 = vmax.f32 %v440_v27, 0.0 }
 0x1bf   :  { %v459_v36 = vmax.f32 %v442_v31, 0.0  ;;  %516 = vmatprep.subr.bf16.mxu0 %v470_v32  ;;  %v496_v11 = vpop.permute.xlu1 %495 }
 0x1c0   :  { %v471_v37 = vpack.c.bf16 %v458_v34, %v454_v33  ;;  %517 = vmatpush1.bf16.msra.mxu0 %v469_v30 }
 0x1c1   :  { %v472_v39 = vpack.c.bf16 %v459_v36, %v455_v35 }
 0x1c3   :  { %569 = vmatprep.subr.bf16.mxu1 %v472_v39  ;;  %1561 = vmatmul.mubr.msk.bf16.vlgmr.msra.gmra.mrb[8].mxu0 %vm331_vm4, %v1645_v38  ;;  %v1647_v39 = vld [vmem:[%s2244_s4 + $0x20] sm:$0xff]  }
 0x1c4   :  { %570 = vmatpush1.bf16.msra.mxu1 %v471_v37  ;;  %556 = vmatprep.mubr.bf16.mxu0 %v1745_v1 }
 0x1c7   :  { %1563 = vmatmul.mubr.msk.bf16.vlgmr.msra.gmra.mrb[8].mxu1 %vm331_vm4, %v1645_v38 }
 0x1c8   :  { %609 = vmatprep.mubr.bf16.mxu1 %v1745_v1 }
 0x1cb   :  { %1562 = vmatmul.mubr.msk.bf16.gmra.mrb[12].mxu0 %vm331_vm4, %v1646_v40 }
 0x1cc   :  { %722 = vmatprep.mubr.bf16.mxu0 %v1745_v1 }
 0x1cf   :  { %1564 = vmatmul.mubr.msk.bf16.gmra.mrb[12].mxu1 %vm331_vm4, %v1646_v40 }
 0x1d0   :  { %775 = vmatprep.mubr.bf16.mxu1 %v1745_v1 }
 0x296   :  { %v548_v44 = vpop.f32.mrb[8].mxu0 }
 0x297   :  { %v549_v45 = vadd.f32 %v548_v44, %v481_v41  ;;  %v550_v46 = vpop.f32.mrb[9].mxu0  ;;  %v657_v44 = vpop.permute.xlu1 %656 }
 0x298   :  { %v551_v47 = vadd.f32 %v550_v46, %v481_v41  ;;  %v552_v48 = vpop.f32.mrb[10].mxu0 }
 0x299   :  { %v553_v49 = vadd.f32 %v552_v48, %v486_v42  ;;  %v554_v50 = vpop.f32.mrb[11].mxu0  ;;  %v620_v56 = vmax.f32 %v549_v45, 0.0 }
 0x29a   :  { %v601_v51 = vpop.f32.mrb[8].mxu1  ;;  %v555_v53 = vadd.f32 %v554_v50, %v486_v42  ;;  %v621_v3 = vmax.f32 %v551_v47, 0.0 }
 0x29b   :  { %v602_v54 = vadd.f32 %v601_v51, %v481_v41  ;;  %v603_v55 = vpop.f32.mrb[9].mxu1  ;;  %v624_v57 = vmax.f32 %v553_v49, 0.0  ;;  %v2014_v46 = vpop.permute.xlu1 %666 }
 0x29c   :  { %v604_v58 = vadd.f32 %v603_v55, %v481_v41  ;;  %v605_v59 = vpop.f32.mrb[10].mxu1  ;;  %v625_v60 = vmax.f32 %v555_v53, 0.0  ;;  %v1648_v41 = vld [vmem:[%s2244_s4 + $0x28] sm:$0xff]  }
 0x29d   :  { %v606_v61 = vadd.f32 %v605_v59, %v486_v42  ;;  %v607_v62 = vpop.f32.mrb[11].mxu1  ;;  %v641_v63 = vpack.c.bf16 %v624_v57, %v620_v56  ;;  %v622_v4 = vmax.f32 %v602_v54, 0.0 }
 0x29e   :  { %v608_v0 = vadd.f32 %v607_v62, %v486_v42  ;;  %v642_v2 = vpack.c.bf16 %v625_v60, %v621_v3  ;;  %v558_v6 = vpop.f32.mrb[12].mxu0  ;;  %v623_v7 = vmax.f32 %v604_v58, 0.0  ;;  %v662_v42 = vpop.permute.xlu0 %661 }
 0x29f   :  { %v626_v5 = vmax.f32 %v606_v61, 0.0  ;;  %v559_v9 = vadd.f32 %v558_v6, %v491_v52  ;;  %v560_v10 = vpop.f32.mrb[13].mxu0  ;;  %v131_v48 = vpop.xlane.xlu1 %130 }
 0x2a0   :  { %v627_v8 = vmax.f32 %v608_v0, 0.0  ;;  %v561_v13 = vadd.f32 %v560_v10, %v491_v52  ;;  %v562_v14 = vpop.f32.mrb[14].mxu0  ;;  %690 = vmatprep.subr.bf16.mxu0 %v642_v2 }
 0x2a1   :  { %v643_v12 = vpack.c.bf16 %v626_v5, %v622_v4  ;;  %v563_v16 = vadd.f32 %v562_v14, %v496_v11  ;;  %v564_v17 = vpop.f32.mrb[15].mxu0  ;;  %691 = vmatpush1.bf16.msra.mxu0 %v641_v63  ;;  %v628_v22 = vmax.f32 %v559_v9, 0.0  ;;  %v73_v63 = vld [vmem:[#allocation2 + $0xa0] sm:$0xff]  ;;  %v149_v9 = vmul.f32 %v1957_v29, %v131_v48  ;;  %v70_v14 = vld [vmem:[#allocation2 + $0x88] sm:$0xff] }
 0x2a2   :  { %v644_v15 = vpack.c.bf16 %v627_v8, %v623_v7  ;;  %v611_v18 = vpop.f32.mrb[12].mxu1  ;;  %v565_v19 = vadd.f32 %v564_v17, %v496_v11  ;;  %v629_v26 = vmax.f32 %v561_v13, 0.0  ;;  %v2012_v45 = vpop.permute.xlu0 %671  ;;  %v72_v8 = vld [vmem:[#allocation2 + $0x98] sm:$0xff] }
 0x2a3   :  { %v612_v20 = vadd.f32 %v611_v18, %v491_v52  ;;  %v613_v21 = vpop.f32.mrb[13].mxu1  ;;  %v632_v23 = vmax.f32 %v563_v16, 0.0  ;;  %v202_v50 = vpop.xlane.xlu1 %201 }
 0x2a4   :  { %v614_v24 = vadd.f32 %v613_v21, %v491_v52  ;;  %v615_v25 = vpop.f32.mrb[14].mxu1  ;;  %743 = vmatprep.subr.bf16.mxu1 %v644_v15  ;;  %v633_v27 = vmax.f32 %v565_v19, 0.0  ;;  %v74_v52 = vld [vmem:[#allocation2 + $0xa8] sm:$0xff]  ;;  %v69_v21 = vld [vmem:[#allocation2 + $0x80] sm:$0xff] }
 0x2a5   :  { %v616_v28 = vadd.f32 %v615_v25, %v496_v11  ;;  %v617_v30 = vpop.f32.mrb[15].mxu1  ;;  %744 = vmatpush1.bf16.msra.mxu1 %v643_v12  ;;  %v645_v31 = vpack.c.bf16 %v632_v23, %v628_v22  ;;  %v630_v34 = vmax.f32 %v612_v20, 0.0  ;;  %v78_v20 = vld [vmem:[#allocation2 + $0xc8] sm:$0xff]  ;;  %v2041_v22 = vmul.f32 %v1964_v43, %v202_v50 }
 0x2a6   :  { %v618_v32 = vadd.f32 %v617_v30, %v496_v11  ;;  %v646_v33 = vpack.c.bf16 %v633_v27, %v629_v26  ;;  %v631_v36 = vmax.f32 %v614_v24, 0.0  ;;  %v134_v47 = vpop.xlane.xlu0 %133  ;;  %v76_v27 = vld [vmem:[#allocation2 + $0xb8] sm:$0xff] }
 0x2a7   :  { %v634_v35 = vmax.f32 %v616_v28, 0.0  ;;  %v150_v51 = vmul.f32 %v1957_v29, %v134_v47  ;;  %v140_v2 = vpop.xlane.xlu1 %139  ;;  %v82_v47 = vld [vmem:[#allocation2 + $0xe8] sm:$0xff] }
 0x2a8   :  { %v635_v37 = vmax.f32 %v618_v32, 0.0  ;;  %692 = vmatprep.subr.bf16.mxu0 %v646_v33  ;;  %v2056_v32 = vmul.f32 %v149_v9, %v70_v14  ;;  %v71_v14 = vld [vmem:[#allocation2 + $0x90] sm:$0xff] }
 0x2a9   :  { %v647_v38 = vpack.c.bf16 %v634_v35, %v630_v34  ;;  %693 = vmatpush1.bf16.msra.mxu0 %v645_v31  ;;  %v2017_v59 = vmul.f32 %v150_v51, %v74_v52  ;;  %v2038_v19 = vmul.f32 %v150_v51, %v73_v63 }
 0x2aa   :  { %v648_v40 = vpack.c.bf16 %v635_v37, %v631_v36  ;;  %v199_v49 = vpop.xlane.xlu0 %198 }
 0x2ab   :  { %v2022_v0 = vmul.f32 %v1964_v43, %v199_v49  ;;  %v274_v25 = vmax.f32 %v2017_v59, 0.0 }
 0x2ac   :  { %745 = vmatprep.subr.bf16.mxu1 %v648_v40  ;;  %1575 = vmatmul.mubr.msk.bf16.vlgmr.msra.gmra.mrb[16].mxu0 %vm331_vm4, %v1647_v39  ;;  %v208_v40 = vpop.xlane.xlu1 %207 }
 0x2ad   :  { %746 = vmatpush1.bf16.msra.mxu1 %v647_v38  ;;  %732 = vmatprep.mubr.bf16.mxu0 %v1745_v1  ;;  %v2048_v26 = vmul.f32 %v2022_v0, %v72_v8  ;;  %v2067_v38 = vmul.f32 %v149_v9, %v69_v21  ;;  %v77_v21 = vld [vmem:[#allocation2 + $0xc0] sm:$0xff] }
 0x2ae   :  { %v137_v56 = vpop.xlane.xlu0 %136 }
 0x2af   :  { %v2031_v13 = vmul.f32 %v1957_v29, %v137_v56 }
 0x2b0   :  { %1577 = vmatmul.mubr.msk.bf16.vlgmr.msra.gmra.mrb[16].mxu1 %vm331_vm4, %v1647_v39  ;;  %v152_v39 = vmul.f32 %v1957_v29, %v140_v2 }
 0x2b1   :  { %785 = vmatprep.mubr.bf16.mxu1 %v1745_v1  ;;  %v2065_v37 = vmul.f32 %v2031_v13, %v78_v20 }
 0x2b2   :  { %v205_v52 = vpop.xlane.xlu0 %204 }
 0x2b4   :  { %1576 = vmatmul.mubr.msk.bf16.gmra.mrb[20].mxu0 %vm331_vm4, %v1648_v41 }
 0x2b5   :  { %911 = vmatprep.mubr.bf16.mxu0 %v1745_v1 }
 0x2b8   :  { %1578 = vmatmul.mubr.msk.bf16.gmra.mrb[20].mxu1 %vm331_vm4, %v1648_v41 }
 0x2b9   :  { %958 = vmatprep.mubr.bf16.mxu1 %v1745_v1 }
 0x37f   :  { %v724_v53 = vpop.f32.mrb[16].mxu0 }
 0x380   :  { %v725_v54 = vadd.f32 %v724_v53, %v657_v44  ;;  %v726_v55 = vpop.f32.mrb[17].mxu0 }
 0x381   :  { %v727_v57 = vadd.f32 %v726_v55, %v657_v44  ;;  %v728_v58 = vpop.f32.mrb[18].mxu0 }
 0x382   :  { %v2019_v3 = vmax.f32 %v725_v54, 0.0  ;;  %v729_v60 = vadd.f32 %v728_v58, %v662_v42  ;;  %v730_v61 = vpop.f32.mrb[19].mxu0  ;;  %v270_v58 = vmax.f32 %v2056_v32, 0.0 }
 0x383   :  { %v777_v62 = vpop.f32.mrb[16].mxu1  ;;  %v2024_v4 = vmax.f32 %v727_v57, 0.0  ;;  %v731_v5 = vadd.f32 %v730_v61, %v662_v42  ;;  %v220_v61 = vmul.f32 %v1964_v43, %v208_v40 }
 0x384   :  { %v778_v6 = vadd.f32 %v777_v62, %v657_v44  ;;  %v779_v7 = vpop.f32.mrb[17].mxu1  ;;  %812 = vst [vmem:[#allocation7] sm:$0xff] %v2019_v3  ;;  %v2028_v10 = vmax.f32 %v729_v60, 0.0  ;;  %v75_v60 = vld [vmem:[#allocation2 + $0xb0] sm:$0xff] }
 0x385   :  { %v780_v11 = vadd.f32 %v779_v7, %v657_v44  ;;  %v781_v12 = vpop.f32.mrb[18].mxu1  ;;  %813 = vst [vmem:[#allocation7 + $0x8] sm:$0xff] %v2024_v4  ;;  %v2034_v15 = vmax.f32 %v731_v5, 0.0  ;;  %v2073_v44 = vmul.f32 %v2041_v22, %v76_v27  ;;  %v81_v5 = vld [vmem:[#allocation2 + $0xe0] sm:$0xff]  ;;  %v84_v7 = vld [vmem:[#allocation2 + $0xf8] sm:$0xff]  ;;  %v243_v27 = vmul.f32 %v2041_v22, %v75_v60 }
 0x386   :  { %v2036_v16 = vmax.f32 %v778_v6, 0.0  ;;  %v782_v17 = vadd.f32 %v781_v12, %v662_v42  ;;  %v783_v18 = vpop.f32.mrb[19].mxu1  ;;  %816 = vst [vmem:[#allocation7 + $0x20] sm:$0xff] %v2028_v10  ;;  %v833_v33 = vpack.c.bf16 %v2028_v10, %v2019_v3  ;;  %v250_v6 = vmul.f32 %v152_v39, %v82_v47  ;;  %v79_v47 = vld [vmem:[#allocation2 + $0xd0] sm:$0xff] }
 0x387   :  { %v2044_v23 = vmax.f32 %v780_v11, 0.0  ;;  %v784_v24 = vadd.f32 %v783_v18, %v662_v42  ;;  %817 = vst [vmem:[#allocation7 + $0x28] sm:$0xff] %v2034_v15  ;;  %v734_v30 = vpop.f32.mrb[20].mxu0  ;;  %v834_v31 = vpack.c.bf16 %v2034_v15, %v2024_v4  ;;  %v249_v32 = vmul.f32 %v152_v39, %v81_v5 }
 0x388   :  { %814 = vst [vmem:[#allocation7 + $0x10] sm:$0xff] %v2036_v16  ;;  %v2052_v28 = vmax.f32 %v782_v17, 0.0  ;;  %v735_v35 = vadd.f32 %v734_v30, %v2014_v46  ;;  %v736_v36 = vpop.f32.mrb[21].mxu0  ;;  %v219_v17 = vmul.f32 %v1964_v43, %v205_v52  ;;  %v276_v30 = vmax.f32 %v2073_v44, 0.0 }
 0x389   :  { %815 = vst [vmem:[#allocation7 + $0x18] sm:$0xff] %v2044_v23  ;;  %v2061_v34 = vmax.f32 %v784_v24, 0.0  ;;  %v737_v41 = vadd.f32 %v736_v36, %v2014_v46  ;;  %v738_v42 = vpop.f32.mrb[22].mxu0  ;;  %879 = vmatprep.subr.bf16.mxu0 %v834_v31  ;;  %v80_v24 = vld [vmem:[#allocation2 + $0xd8] sm:$0xff]  ;;  %v273_v36 = vmax.f32 %v2038_v19, 0.0  ;;  %v282_v40 = vmax.f32 %v250_v6, 0.0 }
 0x38a   :  { %818 = vst [vmem:[#allocation7 + $0x30] sm:$0xff] %v2052_v28  ;;  %v2076_v48 = vmax.f32 %v735_v35, 0.0  ;;  %v739_v49 = vadd.f32 %v738_v42, %v2012_v45  ;;  %v740_v50 = vpop.f32.mrb[23].mxu0  ;;  %880 = vmatpush1.bf16.msra.mxu0 %v833_v33  ;;  %v835_v53 = vpack.c.bf16 %v2052_v28, %v2036_v16  ;;  %v83_v33 = vld [vmem:[#allocation2 + $0xf0] sm:$0xff]  ;;  %v252_v35 = vmul.f32 %v220_v61, %v84_v7  ;;  %v1651_v6 = vld [vmem:[%s2244_s4 + $0x40] sm:$0xff]   ;;  %v1652_v7 = vld [vmem:[%s2244_s4 + $0x48] sm:$0xff]  }
 0x38b   :  { %819 = vst [vmem:[#allocation7 + $0x38] sm:$0xff] %v2061_v34  ;;  %v787_v29 = vpop.f32.mrb[20].mxu1  ;;  %v836_v51 = vpack.c.bf16 %v2061_v34, %v2044_v23  ;;  %v2083_v54 = vmax.f32 %v737_v41, 0.0  ;;  %v741_v55 = vadd.f32 %v740_v50, %v2012_v45  ;;  %v1007_v39 = vpack.c.bf16 %v274_v25, %v270_v58  ;;  %v1649_v41 = vld [vmem:[%s2244_s4 + $0x30] sm:$0xff]  }
 0x38c   :  { %v788_v56 = vadd.f32 %v787_v29, %v2014_v46  ;;  %v789_v57 = vpop.f32.mrb[21].mxu1  ;;  %820 = vst [vmem:[#allocation7 + $0x40] sm:$0xff] %v2076_v48  ;;  %v2090_v62 = vmax.f32 %v739_v49, 0.0  ;;  %v272_v42 = vmax.f32 %v2048_v26, 0.0  ;;  %v245_v44 = vmul.f32 %v2031_v13, %v77_v21 }
 0x38d   :  { %v790_v63 = vadd.f32 %v789_v57, %v2014_v46  ;;  %v791_v2 = vpop.f32.mrb[22].mxu1  ;;  %926 = vmatprep.subr.bf16.mxu1 %v836_v51  ;;  %821 = vst [vmem:[#allocation7 + $0x48] sm:$0xff] %v2083_v54  ;;  %v2094_v8 = vmax.f32 %v741_v55, 0.0  ;;  %v269_v46 = vmax.f32 %v2067_v38, 0.0  ;;  %v239_v38 = vmul.f32 %v2022_v0, %v71_v14 }
 0x38e   :  { %v2096_v9 = vmax.f32 %v788_v56, 0.0  ;;  %v792_v11 = vadd.f32 %v791_v2, %v2012_v45  ;;  %v793_v12 = vpop.f32.mrb[23].mxu1  ;;  %927 = vmatpush1.bf16.msra.mxu1 %v835_v53  ;;  %824 = vst [vmem:[#allocation7 + $0x60] sm:$0xff] %v2090_v62  ;;  %v248_v49 = vmul.f32 %v219_v17, %v80_v24  ;;  %v278_v19 = vmax.f32 %v2065_v37, 0.0  ;;  %v1650_v2 = vld [vmem:[%s2244_s4 + $0x38] sm:$0xff]  }
 0x38f   :  { %v2102_v18 = vmax.f32 %v790_v63, 0.0  ;;  %v794_v20 = vadd.f32 %v793_v12, %v2012_v45  ;;  %825 = vst [vmem:[#allocation7 + $0x68] sm:$0xff] %v2094_v8  ;;  %v838_v43 = vpack.c.bf16 %v2094_v8, %v2083_v54  ;;  %v837_v45 = vpack.c.bf16 %v2090_v62, %v2076_v48 }
 0x390   :  { %822 = vst [vmem:[#allocation7 + $0x50] sm:$0xff] %v2096_v9  ;;  %v2109_v31 = vmax.f32 %v792_v11, 0.0  ;;  %v275_v59 = vmax.f32 %v243_v27, 0.0  ;;  %v251_v25 = vmul.f32 %v220_v61, %v83_v33  ;;  %v1006_v29 = vpack.c.bf16 %v273_v36, %v269_v46  ;;  %v2159_v11 = vpop.permute.xlu1 %1026 }
 0x391   :  { %823 = vst [vmem:[#allocation7 + $0x58] sm:$0xff] %v2102_v18  ;;  %v2116_v22 = vmax.f32 %v794_v20, 0.0  ;;  %881 = vmatprep.subr.bf16.mxu0 %v838_v43  ;;  %v281_v26 = vmax.f32 %v249_v32, 0.0  ;;  %v284_v51 = vmax.f32 %v252_v35, 0.0  ;;  %v1009_v13 = vpack.c.bf16 %v276_v30, %v272_v42 }
 0x392   :  { %826 = vst [vmem:[#allocation7 + $0x70] sm:$0xff] %v2109_v31  ;;  %882 = vmatpush1.bf16.msra.mxu0 %v837_v45  ;;  %v839_v50 = vpack.c.bf16 %v2109_v31, %v2096_v9  ;;  %v271_v52 = vmax.f32 %v239_v38, 0.0  ;;  %v247_v53 = vmul.f32 %v219_v17, %v79_v47  ;;  %v1011_v55 = vpack.c.bf16 %v282_v40, %v278_v19 }
 0x393   :  { %827 = vst [vmem:[#allocation7 + $0x78] sm:$0xff] %v2116_v22  ;;  %v840_v0 = vpack.c.bf16 %v2116_v22, %v2102_v18  ;;  %1055 = vmatprep.subr.bf16.mxu0 %v1007_v39  ;;  %v277_v56 = vmax.f32 %v245_v44, 0.0  ;;  %v280_v57 = vmax.f32 %v248_v49, 0.0  ;;  %v283_v58 = vmax.f32 %v251_v25, 0.0  ;;  %v985_v25 = vld [vmem:[#allocation5 + $0x20] sm:$0xff] }
 0x394   :  { %v1008_v37 = vpack.c.bf16 %v275_v59, %v271_v52  ;;  %v279_v63 = vmax.f32 %v247_v53, 0.0  ;;  %v2161_v12 = vpop.permute.xlu1 %1031  ;;  %v1022_v53 = vpop.permute.xlu0 %1021 }
 0x395   :  { %928 = vmatprep.subr.bf16.mxu1 %v840_v0  ;;  %1589 = vmatmul.mubr.msk.bf16.vlgmr.msra.gmra.mrb[24].mxu0 %vm331_vm4, %v1649_v41  ;;  %v1010_v60 = vpack.c.bf16 %v281_v26, %v277_v56  ;;  %v1013_v61 = vpack.c.bf16 %v284_v51, %v280_v57  ;;  %v982_v56 = vld [vmem:[#allocation5 + $0x8] sm:$0xff]  ;;  %v987_v57 = vld [vmem:[#allocation5 + $0x30] sm:$0xff] }
 0x396   :  { %929 = vmatpush1.bf16.msra.mxu1 %v839_v50  ;;  %1056 = vmatpush1.bf16.msra.mxu0 %v1006_v29  ;;  %v1012_v5 = vpack.c.bf16 %v283_v58, %v279_v63  ;;  %v986_v29 = vld [vmem:[#allocation5 + $0x28] sm:$0xff] }
 0x397   :  { %1108 = vmatprep.subr.bf16.mxu1 %v1009_v13  ;;  %1057 = vmatprep.subr.bf16.mxu0 %v1011_v55  ;;  %v981_v13 = vld [vmem:[#allocation5] sm:$0xff] }
 0x398   :  { %919 = vmatprep.mubr.bf16.mxu0 %v1745_v1  ;;  %v2163_v14 = vpop.permute.xlu1 %1213 }
 0x399   :  { %1591 = vmatmul.mubr.msk.bf16.vlgmr.msra.gmra.mrb[24].mxu1 %vm331_vm4, %v1649_v41 }
 0x39a   :  { %1109 = vmatpush1.bf16.msra.mxu1 %v1008_v37  ;;  %966 = vmatprep.mubr.bf16.mxu1 %v1745_v1 }
 0x39b   :  { %1058 = vmatpush1.bf16.msra.mxu0 %v1010_v60  ;;  %1110 = vmatprep.subr.bf16.mxu1 %v1013_v61  ;;  %v988_v60 = vld [vmem:[#allocation5 + $0x38] sm:$0xff] }
 0x39c   :  { %v2165_v17 = vpop.permute.xlu1 %1223 }
 0x39d   :  { %1590 = vmatmul.mubr.msk.bf16.gmra.mrb[28].mxu0 %vm331_vm4, %v1650_v2 }
 0x39e   :  { %1111 = vmatpush1.bf16.msra.mxu1 %v1012_v5  ;;  %1087 = vmatprep.mubr.bf16.mxu0 %v1745_v1 }
 0x3a0   :  { %v849_v46 = vpop.permute.xlu1 %848 }
 0x3a1   :  { %1592 = vmatmul.mubr.msk.bf16.gmra.mrb[28].mxu1 %vm331_vm4, %v1650_v2 }
 0x3a2   :  { %1140 = vmatprep.mubr.bf16.mxu1 %v1745_v1 }
 0x3a5   :  { %1603 = vmatmul.mubr.msk.bf16.vlgmr.msra.gmra.mrb[32].mxu0 %vm331_vm4, %v1651_v6 }
 0x3a6   :  { %1097 = vmatprep.mubr.bf16.mxu0 %v1745_v1 }
 0x3a9   :  { %1605 = vmatmul.mubr.msk.bf16.vlgmr.msra.gmra.mrb[32].mxu1 %vm331_vm4, %v1651_v6  ;;  %v983_v6 = vld [vmem:[#allocation5 + $0x10] sm:$0xff] }
 0x3aa   :  { %1150 = vmatprep.mubr.bf16.mxu1 %v1745_v1 }
 0x3ad   :  { %1604 = vmatmul.mubr.msk.bf16.gmra.mrb[36].mxu0 %vm331_vm4, %v1652_v7 }
 0x3ae   :  { %1279 = vmatprep.mubr.bf16.mxu0 %v1745_v1 }
 0x3b1   :  { %1606 = vmatmul.mubr.msk.bf16.gmra.mrb[36].mxu1 %vm331_vm4, %v1652_v7 }
 0x3b2   :  { %1332 = vmatprep.mubr.bf16.mxu1 %v1745_v1 }
 0x468   :  { %v913_v20 = vpop.f32.mrb[24].mxu0 }
 0x469   :  { %v914_v21 = vadd.f32 %v913_v20, %v849_v46  ;;  %v915_v24 = vpop.f32.mrb[25].mxu0 }
 0x46a   :  { %v916_v27 = vadd.f32 %v915_v24, %v849_v46  ;;  %v917_v30 = vpop.f32.mrb[26].mxu0 }
 0x46b   :  { %v973_v43 = vmul.f32 1.442695, %v914_v21  ;;  %v918_v32 = vpop.f32.mrb[27].mxu0 }
 0x46c   :  { %v960_v33 = vpop.f32.mrb[24].mxu1  ;;  %v975_v35 = vmul.f32 1.442695, %v916_v27  ;;  %v984_v27 = vld [vmem:[#allocation5 + $0x18] sm:$0xff] }
 0x46d   :  { %v961_v45 = vadd.f32 %v960_v33, %v849_v46  ;;  %v962_v36 = vpop.f32.mrb[25].mxu1  ;;  %1661 = vpow2.f32 %v973_v43 }
 0x46e   :  { %v963_v38 = vadd.f32 %v962_v36, %v849_v46  ;;  %v964_v40 = vpop.f32.mrb[26].mxu1  ;;  %1663 = vpow2.f32 %v975_v35 }
 0x46f   :  { %v977_v39 = vmul.f32 1.442695, %v961_v45  ;;  %v965_v41 = vpop.f32.mrb[27].mxu1 }
 0x470   :  { %v979_v42 = vmul.f32 1.442695, %v963_v38  ;;  %v921_v44 = vpop.f32.mrb[28].mxu0 }
 0x471   :  { %1665 = vpow2.f32 %v977_v39  ;;  %v922_v47 = vpop.f32.mrb[29].mxu0 }
 0x472   :  { %1667 = vpow2.f32 %v979_v42  ;;  %v923_v49 = vpop.f32.mrb[30].mxu0 }
 0x473   :  { %v924_v0 = vpop.f32.mrb[31].mxu0 }
 0x474   :  { %v968_v19 = vpop.f32.mrb[28].mxu1 }
 0x475   :  { %v969_v59 = vpop.f32.mrb[29].mxu1 }
 0x476   :  { %v970_v50 = vpop.f32.mrb[30].mxu1 }
 0x477   :  { %v971_v26 = vpop.f32.mrb[31].mxu1  ;;  %v1662_v51 = vpop.eup %1661 }
 0x478   :  { %v1664_v52 = vpop.eup %1663  ;;  %v989_v55 = vmul.f32 %v1662_v51, %v985_v25  ;;  %v1089_v37 = vpop.f32.mrb[32].mxu0 }
 0x479   :  { %v990_v58 = vmul.f32 %v1664_v52, %v986_v29  ;;  %v1090_v61 = vadd.f32 %v1089_v37, %v1022_v53  ;;  %v1091_v63 = vpop.f32.mrb[33].mxu0 }
 0x47a   :  { %v993_v5 = vadd.f32 %v989_v55, %v981_v13  ;;  %v1092_v7 = vadd.f32 %v1091_v63, %v1022_v53  ;;  %v1093_v46 = vpop.f32.mrb[34].mxu0 }
 0x47b   :  { %v1666_v2 = vpop.eup %1665  ;;  %v994_v21 = vadd.f32 %v990_v58, %v982_v56  ;;  %v1161_v30 = vmax.f32 %v1090_v61, 0.0  ;;  %v1094_v43 = vadd.f32 %v1093_v46, %v2159_v11  ;;  %v1095_v32 = vpop.f32.mrb[35].mxu0 }
 0x47c   :  { %v1668_v20 = vpop.eup %1667  ;;  %v991_v24 = vmul.f32 %v1666_v2, %v987_v57  ;;  %v1142_v33 = vpop.f32.mrb[32].mxu1  ;;  %997 = vst [vmem:[#allocation7 + $0x80] sm:$0xff] %v993_v5  ;;  %v1162_v45 = vmax.f32 %v1092_v7, 0.0  ;;  %v1096_v36 = vadd.f32 %v1095_v32, %v2159_v11 }
 0x47d   :  { %v992_v35 = vmul.f32 %v1668_v20, %v988_v60  ;;  %v1143_v38 = vadd.f32 %v1142_v33, %v1022_v53  ;;  %v1144_v40 = vpop.f32.mrb[33].mxu1  ;;  %998 = vst [vmem:[#allocation7 + $0x88] sm:$0xff] %v994_v21  ;;  %v1165_v41 = vmax.f32 %v1094_v43, 0.0  ;;  %v1177_v49 = vadd.f32 %v1161_v30, %v2019_v3  ;;  %v1037_v57 = vpop.permute.xlu0 %1036 }
 0x47e   :  { %v995_v39 = vadd.f32 %v991_v24, %v983_v6  ;;  %v1145_v42 = vadd.f32 %v1144_v40, %v1022_v53  ;;  %v1146_v44 = vpop.f32.mrb[34].mxu1  ;;  %v1166_v0 = vmax.f32 %v1096_v36, 0.0  ;;  %v1178_v51 = vadd.f32 %v1162_v45, %v2024_v4 }
 0x47f   :  { %v996_v47 = vadd.f32 %v992_v35, %v984_v27  ;;  %v1163_v19 = vmax.f32 %v1143_v38, 0.0  ;;  %v1148_v59 = vpop.f32.mrb[35].mxu1  ;;  %v1181_v25 = vadd.f32 %v1165_v41, %v2028_v10  ;;  %v1147_v29 = vadd.f32 %v1146_v44, %v2159_v11 }
 0x480   :  { %999 = vst [vmem:[#allocation7 + $0x90] sm:$0xff] %v995_v39  ;;  %v1164_v50 = vmax.f32 %v1145_v42, 0.0  ;;  %v1149_v26 = vadd.f32 %v1148_v59, %v2159_v11  ;;  %v1182_v13 = vadd.f32 %v1166_v0, %v2034_v15  ;;  %v1099_v52 = vpop.f32.mrb[36].mxu0 }
 0x481   :  { %1000 = vst [vmem:[#allocation7 + $0x98] sm:$0xff] %v996_v47  ;;  %v1198_v53 = vpack.c.bf16 %v1181_v25, %v1177_v49  ;;  %v1167_v55 = vmax.f32 %v1147_v29, 0.0  ;;  %v1101_v56 = vpop.f32.mrb[37].mxu0  ;;  %v1179_v37 = vadd.f32 %v1163_v19, %v2036_v16  ;;  %v1100_v10 = vadd.f32 %v1099_v52, %v2161_v12  ;;  %v1219_v0 = vpop.permute.xlu0 %1218 }
 0x482   :  { %v1168_v3 = vmax.f32 %v1149_v26, 0.0  ;;  %v1102_v58 = vadd.f32 %v1101_v56, %v2161_v12  ;;  %v1103_v60 = vpop.f32.mrb[38].mxu0  ;;  %v1199_v61 = vpack.c.bf16 %v1182_v13, %v1178_v51  ;;  %v1180_v11 = vadd.f32 %v1164_v50, %v2044_v23 }
 0x483   :  { %v1183_v4 = vadd.f32 %v1167_v55, %v2052_v28  ;;  %v1104_v63 = vadd.f32 %v1103_v60, %v1037_v57  ;;  %v1105_v2 = vpop.f32.mrb[39].mxu0  ;;  %v1169_v6 = vmax.f32 %v1100_v10, 0.0 }
 0x484   :  { %v1184_v15 = vadd.f32 %v1168_v3, %v2061_v34  ;;  %v1152_v5 = vpop.f32.mrb[36].mxu1  ;;  %v1170_v7 = vmax.f32 %v1102_v58, 0.0  ;;  %v1106_v46 = vadd.f32 %v1105_v2, %v1037_v57  ;;  %1247 = vmatprep.subr.bf16.mxu0 %v1199_v61 }
 0x485   :  { %v1153_v16 = vadd.f32 %v1152_v5, %v2161_v12  ;;  %v1154_v20 = vpop.f32.mrb[37].mxu1  ;;  %v1200_v21 = vpack.c.bf16 %v1183_v4, %v1179_v37  ;;  %v1173_v24 = vmax.f32 %v1104_v63, 0.0  ;;  %1248 = vmatpush1.bf16.msra.mxu0 %v1198_v53  ;;  %v1185_v28 = vadd.f32 %v1169_v6, %v2076_v48 }
 0x486   :  { %v1155_v27 = vadd.f32 %v1154_v20, %v2161_v12  ;;  %v1156_v23 = vpop.f32.mrb[38].mxu1  ;;  %v1201_v30 = vpack.c.bf16 %v1184_v15, %v1180_v11  ;;  %v1174_v34 = vmax.f32 %v1106_v46, 0.0  ;;  %v1186_v38 = vadd.f32 %v1170_v7, %v2083_v54  ;;  %v1653_v54 = vld [vmem:[%s2244_s4 + $0x50] sm:$0xff]   ;;  %v1229_v7 = vpop.permute.xlu0 %1228 }
 0x487   :  { %v1171_v43 = vmax.f32 %v1153_v16, 0.0  ;;  %v1158_v32 = vpop.f32.mrb[39].mxu1  ;;  %v1189_v33 = vadd.f32 %v1173_v24, %v2090_v62  ;;  %v1157_v45 = vadd.f32 %v1156_v23, %v1037_v57 }
 0x488   :  { %v1172_v35 = vmax.f32 %v1155_v27, 0.0  ;;  %v1159_v36 = vadd.f32 %v1158_v32, %v1037_v57  ;;  %1300 = vmatprep.subr.bf16.mxu1 %v1201_v30  ;;  %v1190_v40 = vadd.f32 %v1174_v34, %v2094_v8 }
 0x489   :  { %1301 = vmatpush1.bf16.msra.mxu1 %v1200_v21  ;;  %v1202_v12 = vpack.c.bf16 %v1189_v33, %v1185_v28  ;;  %v1175_v39 = vmax.f32 %v1157_v45, 0.0  ;;  %v1187_v48 = vadd.f32 %v1171_v43, %v2096_v9  ;;  %v1654_v9 = vld [vmem:[%s2244_s4 + $0x58] sm:$0xff]  }
 0x48a   :  { %v1176_v41 = vmax.f32 %v1159_v36, 0.0  ;;  %v1203_v42 = vpack.c.bf16 %v1190_v40, %v1186_v38  ;;  %v1188_v44 = vadd.f32 %v1172_v35, %v2102_v18 }
 0x48b   :  { %v1191_v47 = vadd.f32 %v1175_v39, %v2109_v31 }
 0x48c   :  { %v1192_v62 = vadd.f32 %v1176_v41, %v2116_v22  ;;  %1249 = vmatprep.subr.bf16.mxu0 %v1203_v42 }
 0x48d   :  { %v1204_v49 = vpack.c.bf16 %v1191_v47, %v1187_v48  ;;  %1250 = vmatpush1.bf16.msra.mxu0 %v1202_v12 }
 0x48e   :  { %v1205_v8 = vpack.c.bf16 %v1192_v62, %v1188_v44 }
 0x490   :  { %1302 = vmatprep.subr.bf16.mxu1 %v1205_v8  ;;  %1617 = vmatmul.mubr.msk.bf16.vlgmr.msra.gmra.mrb[40].mxu0 %vm331_vm4, %v1653_v54 }
 0x491   :  { %1303 = vmatpush1.bf16.msra.mxu1 %v1204_v49  ;;  %1289 = vmatprep.mubr.bf16.mxu0 %v1745_v1  ;;  %v1390_v49 = vpop.permute.xlu0 %1389 }
 0x494   :  { %1619 = vmatmul.mubr.msk.bf16.vlgmr.msra.gmra.mrb[40].mxu1 %vm331_vm4, %v1653_v54  ;;  %v1656_v54 = vld [vmem:[%s2244_s4 + $0x68] sm:$0xff]  }
 0x495   :  { %1342 = vmatprep.mubr.bf16.mxu1 %v1745_v1 }
 0x498   :  { %1618 = vmatmul.mubr.msk.bf16.gmra.mrb[44].mxu0 %vm331_vm4, %v1654_v9 }
 0x499   :  { %1452 = vmatprep.mubr.bf16.mxu0 %v1745_v1 }
 0x49c   :  { %1620 = vmatmul.mubr.msk.bf16.gmra.mrb[44].mxu1 %vm331_vm4, %v1654_v9 }
 0x49d   :  { %1499 = vmatprep.mubr.bf16.mxu1 %v1745_v1 }
 0x563   :  { %v1281_v18 = vpop.f32.mrb[40].mxu0 }
 0x564   :  { %v1282_v31 = vadd.f32 %v1281_v18, %v2163_v14  ;;  %v1283_v22 = vpop.f32.mrb[41].mxu0 }
 0x565   :  { %v1284_v19 = vadd.f32 %v1283_v22, %v2163_v14  ;;  %v1285_v59 = vpop.f32.mrb[42].mxu0 }
 0x566   :  { %v1286_v25 = vadd.f32 %v1285_v59, %v1219_v0  ;;  %v1287_v50 = vpop.f32.mrb[43].mxu0  ;;  %v1353_v52 = vmax.f32 %v1282_v31, 0.0 }
 0x567   :  { %v1334_v29 = vpop.f32.mrb[40].mxu1  ;;  %v1288_v26 = vadd.f32 %v1287_v50, %v1219_v0  ;;  %v1354_v56 = vmax.f32 %v1284_v19, 0.0 }
 0x568   :  { %v1335_v51 = vadd.f32 %v1334_v29, %v2163_v14  ;;  %v1336_v13 = vpop.f32.mrb[41].mxu1  ;;  %v1357_v53 = vmax.f32 %v1286_v25, 0.0 }
 0x569   :  { %v1337_v55 = vadd.f32 %v1336_v13, %v2163_v14  ;;  %v1338_v3 = vpop.f32.mrb[42].mxu1  ;;  %v1358_v57 = vmax.f32 %v1288_v26, 0.0 }
 0x56a   :  { %v1339_v37 = vadd.f32 %v1338_v3, %v1219_v0  ;;  %v1340_v10 = vpop.f32.mrb[43].mxu1  ;;  %v1374_v58 = vpack.c.bf16 %v1357_v53, %v1353_v52  ;;  %v1355_v11 = vmax.f32 %v1335_v51, 0.0 }
 0x56b   :  { %v1341_v60 = vadd.f32 %v1340_v10, %v1219_v0  ;;  %v1375_v61 = vpack.c.bf16 %v1358_v57, %v1354_v56  ;;  %v1291_v15 = vpop.f32.mrb[44].mxu0  ;;  %v1356_v63 = vmax.f32 %v1337_v55, 0.0 }
 0x56c   :  { %v1359_v4 = vmax.f32 %v1339_v37, 0.0  ;;  %v1292_v5 = vadd.f32 %v1291_v15, %v2165_v17  ;;  %v1293_v6 = vpop.f32.mrb[45].mxu0 }
 0x56d   :  { %v1360_v2 = vmax.f32 %v1341_v60, 0.0  ;;  %v1294_v14 = vadd.f32 %v1293_v6, %v2165_v17  ;;  %v1295_v16 = vpop.f32.mrb[46].mxu0  ;;  %1420 = vmatprep.subr.bf16.mxu0 %v1375_v61 }
 0x56e   :  { %v1376_v46 = vpack.c.bf16 %v1359_v4, %v1355_v11  ;;  %v1296_v21 = vadd.f32 %v1295_v16, %v1229_v7  ;;  %v1297_v24 = vpop.f32.mrb[47].mxu0  ;;  %1421 = vmatpush1.bf16.msra.mxu0 %v1374_v58  ;;  %v1361_v34 = vmax.f32 %v1292_v5, 0.0 }
 0x56f   :  { %v1377_v20 = vpack.c.bf16 %v1360_v2, %v1356_v63  ;;  %v1344_v27 = vpop.f32.mrb[44].mxu1  ;;  %v1298_v23 = vadd.f32 %v1297_v24, %v1229_v7  ;;  %v1362_v35 = vmax.f32 %v1294_v14, 0.0 }
 0x570   :  { %v1345_v30 = vadd.f32 %v1344_v27, %v2165_v17  ;;  %v1346_v28 = vpop.f32.mrb[45].mxu1  ;;  %v1365_v43 = vmax.f32 %v1296_v21, 0.0 }
 0x571   :  { %v1347_v32 = vadd.f32 %v1346_v28, %v2165_v17  ;;  %v1348_v33 = vpop.f32.mrb[46].mxu1  ;;  %1467 = vmatprep.subr.bf16.mxu1 %v1377_v20  ;;  %v1366_v45 = vmax.f32 %v1298_v23, 0.0  ;;  %v1655_v17 = vld [vmem:[%s2244_s4 + $0x60] sm:$0xff]   ;;  %s1713_s4 = scalar_lea.vmem %s1524_s25, 3072 }
 0x572   :  { %v1349_v36 = vadd.f32 %v1348_v33, %v1229_v7  ;;  %v1350_v38 = vpop.f32.mrb[47].mxu1  ;;  %1468 = vmatpush1.bf16.msra.mxu1 %v1376_v46  ;;  %v1378_v40 = vpack.c.bf16 %v1365_v43, %v1361_v34  ;;  %v1363_v41 = vmax.f32 %v1345_v30, 0.0  ;;  %p1714_p2 = scmp.ne.s32.totalorder %s1524_s25, %s1713_s4  ;;  %p1719_p4 = scmp.lt.s32.totalorder %s1713_s4, %s1713_s4 }
 0x573   :  { %v1351_v12 = vadd.f32 %v1350_v38, %v1229_v7  ;;  %v1379_v39 = vpack.c.bf16 %v1366_v45, %v1362_v35  ;;  %v1364_v48 = vmax.f32 %v1347_v32, 0.0 }
 0x574   :  { %v1367_v42 = vmax.f32 %v1349_v36, 0.0  ;;  %p1720_p5 = por %p1719_p4, %p1718_p3 }
 0x575   :  { %v1368_v44 = vmax.f32 %v1351_v12, 0.0  ;;  %1422 = vmatprep.subr.bf16.mxu0 %v1379_v39 }
 0x576   :  { %v1380_v47 = vpack.c.bf16 %v1367_v42, %v1363_v41  ;;  %1423 = vmatpush1.bf16.msra.mxu0 %v1378_v40  ;;  %p1721_p6 = pnand %p1720_p5, %p1714_p2 }
 0x577   :  { %v1381_v62 = vpack.c.bf16 %v1368_v44, %v1364_v48 }
 0x579   :  { %1469 = vmatprep.subr.bf16.mxu1 %v1381_v62  ;;  %1631 = vmatmul.mubr.msk.bf16.vlgmr.msra.gmra.mrb[48].mxu0 %vm331_vm4, %v1655_v17 }
 0x57a   :  { %1470 = vmatpush1.bf16.msra.mxu1 %v1380_v47  ;;  %1460 = vmatprep.mubr.bf16.mxu0 %v1745_v1 }
 0x57d   :  { %1633 = vmatmul.mubr.msk.bf16.vlgmr.msra.gmra.mrb[48].mxu1 %vm331_vm4, %v1655_v17 }
 0x57e   :  { %1507 = vmatprep.mubr.bf16.mxu1 %v1745_v1 }
 0x581   :  { %1632 = vmatmul.mubr.msk.bf16.gmra.mrb[52].mxu0 %vm331_vm4, %v1656_v54 }
 0x585   :  { %1634 = vmatmul.mubr.msk.bf16.gmra.mrb[52].mxu1 %vm331_vm4, %v1656_v54 }
 0x64c   :  { %v1454_v8 = vpop.f32.mrb[48].mxu0 }
 0x64d   :  { %v1455_v9 = vadd.f32 %v1454_v8, %v1390_v49  ;;  %v1456_v18 = vpop.f32.mrb[49].mxu0 }
 0x64e   :  { %v1457_v31 = vadd.f32 %v1456_v18, %v1390_v49  ;;  %v1458_v22 = vpop.f32.mrb[50].mxu0 }
 0x64f   :  { %1514 = vst [vmem:[#allocation7 + $0xa0] sm:$0xff] %v1455_v9  ;;  %v1459_v19 = vpop.f32.mrb[51].mxu0 }
 0x650   :  { %v1501_v0 = vpop.f32.mrb[48].mxu1  ;;  %1515 = vst [vmem:[#allocation7 + $0xa8] sm:$0xff] %v1457_v31 }
 0x651   :  { %v1502_v1 = vadd.f32 %v1501_v0, %v1390_v49  ;;  %v1503_v59 = vpop.f32.mrb[49].mxu1 }
 0x652   :  { %v1504_v25 = vadd.f32 %v1503_v59, %v1390_v49  ;;  %v1505_v50 = vpop.f32.mrb[50].mxu1 }
 0x653   :  { %1516 = vst [vmem:[#allocation7 + $0xb0] sm:$0xff] %v1502_v1  ;;  %v1506_v29 = vpop.f32.mrb[51].mxu1 }
 0x654   :  { %1517 = vst [vmem:[#allocation7 + $0xb8] sm:$0xff] %v1504_v25  ;;  %v1462_v26 = vpop.f32.mrb[52].mxu0 }
 0x655   :  { %1724 = shalt.err (!%p1721_p6)
}
 0x656   :  { %s1725_s28 = scalar_lea.hbm %s2246_s6, 3072 }
 0x657   :  { %p1726_p7 = scmp.ne.s32.totalorder %s2246_s6, %s1725_s28  ;;  %p1729_p8 = scmp.lt.u32.totalorder %s1725_s28, %s2246_s6 }
 0x659   :  { %p1731_p9 = pnand %p1729_p8, %p1726_p7 }
 0x65b   :  { %1734 = shalt.err (!%p1731_p9)
}
 0x65c   :  { %1529 = dma.vmem_to_hbm [thread:$0]  %s1524_s25, 3072, %s2246_s6, [#allocation4], %s1742_s7, %s1742_s7, %s1743_s8   ;;  %v1463_v51 = vpop.f32.mrb[53].mxu0  ;;  %v1509_v52 = vpop.f32.mrb[52].mxu1 }
 0x65d   :  { %v1464_v13 = vpop.f32.mrb[54].mxu0  ;;  %v1510_v55 = vpop.f32.mrb[53].mxu1 }
 0x65e   :  { %v1465_v53 = vpop.f32.mrb[55].mxu0  ;;  %v1511_v3 = vpop.f32.mrb[54].mxu1 }
 0x65f   :  { %v1512_v56 = vpop.f32.mrb[55].mxu1 }
 0x660   :  { %1739 = dma.done.wait [#allocation4], 3072  }
 0x661   :  { %1740 = vsyncadd [#allocation4], 4294964224 }
 0x662   :  { %1533 = vsyncpa [#allocation3], 1 }
 0x663   :  { %1534 = vsyncpa [#allocation6], 1 }
 0x664   :  { %1535 = vsyncpa [#allocation4], 1 }

</bundles_post_ra>
